<compile_context>
chip_gen: v7x
topology: tpu7x:2x2x1
jax: 0.10.0
libtpu: 0.0.40
codegen_flags: <defaults>
</compile_context>

<pallas_src>
import functools

import jax
import jax.numpy as jnp
from jax.experimental import pallas as pl
from jax.experimental.pallas import tpu as pltpu

# ----------------------------- model hyper-parameters -----------------------------
D_TEXT, D_IMAGE, D_OTHER = 16, 16, 16          # input_dim = [text, image, other]
INI_TEXT, INI_IMAGE, INI_OTHER = 16, 16, 16    # ini_hidden_dim
HIDDEN = 16                                    # hidden_dim -> embed_d = 2*HIDDEN
EMBED_D = 2 * HIDDEN                           # 32
U_INPUT, U_INI, U_HIDDEN, U_OUT = EMBED_D, 16, 16, EMBED_D
P_INPUT, P_INI, P_HIDDEN, P_OUT = EMBED_D, 16, 16, EMBED_D
OUT_EMBED_D = EMBED_D                          # 32
OUTEMB_D = 8
N_USER_NEIGH = 4
N_POST_NEIGH = 4

NODE_BLK_MAX = 128                             # het_nodes per grid step (kept a multiple of 8)


def _sigmoid(x):
    return 1.0 / (1.0 + jnp.exp(-x))


# ----------------------------- the fused Pallas kernel -----------------------------
def het_gnn_kernel(text_ref, other_ref, image_ref, mean_u_ref, mean_p_ref,
                   w_text_ref, b_text_ref, w_image_ref, b_image_ref,
                   w_other_ref, b_other_ref,
                   w_u_ref, b_u_ref, w_uo_ref, b_uo_ref,
                   w_p_ref, b_p_ref, w_po_ref, b_po_ref,
                   att_top_ref, att_bot_ref, w_out_ref, b_out_ref,
                   out_ref, *, blk, n_user, n_post, hidden, u_hidden, p_hidden):
    """Whole Het_GNN forward for one block of `blk` het_nodes (one grid step)."""

    def bilstm(x, w_ref, b_ref, h):
        # Folded init-Linear + packed bidirectional LSTM gates: one (R, din)@(din, 6h) matmul.
        # Gate columns: [i_f,i_r | g_f,g_r | o_f,o_r]; c0 == 0 so the forget gate is dropped.
        gates = jnp.dot(x, w_ref[...], preferred_element_type=jnp.float32) + b_ref[...]
        h2 = 2 * h
        i = _sigmoid(gates[:, 0:h2])
        g = jnp.tanh(gates[:, h2:2 * h2])
        o = _sigmoid(gates[:, 2 * h2:3 * h2])
        return o * jnp.tanh(i * g)                       # (R, 2h) == concat(h_fwd, h_rev)

    r_c, r_u, r_p = blk, blk * n_user, blk * n_post

    # ---- Bi_RNN content embeddings.  All rows sharing a modality weight (self + user
    #      neighbors + post neighbors of every node in the block) batched per matmul. ----
    text_h = bilstm(text_ref[0], w_text_ref, b_text_ref, hidden)      # (r_c+r_u+r_p, E)
    other_h = bilstm(other_ref[0], w_other_ref, b_other_ref, hidden)  # (r_c+r_u, E)
    image_h = bilstm(image_ref[0], w_image_ref, b_image_ref, hidden)  # (r_p, E)

    c_agg = 0.5 * (text_h[0:r_c] + other_h[0:r_c])                              # (blk, E)
    u_content = 0.5 * (text_h[r_c:r_c + r_u] + other_h[r_c:r_c + r_u])          # (blk*Nu, E)
    p_content = 0.5 * (text_h[r_c + r_u:r_c + r_u + r_p] + image_h)             # (blk*Np, E)

    # ---- SameType_Agg_Bi_RNN (dropout == identity).  Per-node neighbor mean is one matmul
    #      against a constant block-diagonal 1/N matrix; output Linear applied after the mean. ----
    u_h = bilstm(u_content, w_u_ref, b_u_ref, u_hidden)                          # (blk*Nu, 2Uh)
    u_mean = jnp.dot(mean_u_ref[...], u_h, preferred_element_type=jnp.float32)   # (blk, 2Uh)
    u_agg = jnp.dot(u_mean, w_uo_ref[...], preferred_element_type=jnp.float32) + b_uo_ref[...]

    p_h = bilstm(p_content, w_p_ref, b_p_ref, p_hidden)
    p_mean = jnp.dot(mean_p_ref[...], p_h, preferred_element_type=jnp.float32)
    p_agg = jnp.dot(p_mean, w_po_ref[...], preferred_element_type=jnp.float32) + b_po_ref[...]

    # ---- attention over (self, user-agg, post-agg): score_j = [c, emb_j] . u_neigh_att ----
    att_top = att_top_ref[...]
    att_bot = att_bot_ref[...]
    base = jnp.sum(c_agg * att_top, axis=1, keepdims=True)                       # (blk, 1)

    def score(e):
        s = base + jnp.sum(e * att_bot, axis=1, keepdims=True)
        return jnp.where(s >= 0.0, s, 0.01 * s)                                  # LeakyReLU(0.01)

    s_c, s_u, s_p = score(c_agg), score(u_agg), score(p_agg)
    m = jnp.maximum(jnp.maximum(s_c, s_u), s_p)
    e_c, e_u, e_p = jnp.exp(s_c - m), jnp.exp(s_u - m), jnp.exp(s_p - m)
    agg = (e_c * c_agg + e_u * u_agg + e_p * p_agg) / (e_c + e_u + e_p)          # (blk, E)

    # ---- output head: out_linear + sigmoid ----
    pred = jnp.dot(agg, w_out_ref[...], preferred_element_type=jnp.float32) + b_out_ref[...]
    out_ref[0] = _sigmoid(pred)                                                  # (blk, outemb_d)


# ----------------------------- pallas_call wrappers -----------------------------
def _block_mean_matrix(blk, n_neigh):
    """(blk, blk*n_neigh) block-diagonal matrix of 1/n_neigh: per-node neighbor mean as a matmul."""
    rows = jnp.arange(blk, dtype=jnp.int32)[:, None]
    cols = jnp.arange(blk * n_neigh, dtype=jnp.int32)[None, :]
    return jnp.where(cols // n_neigh == rows, 1.0 / n_neigh, 0.0).astype(jnp.float32)


def _pad_nodes(x, nb_pad):
    pad = nb_pad - x.shape[0]
    if pad == 0:
        return x
    return jnp.concatenate([x, jnp.zeros((pad,) + x.shape[1:], x.dtype)], axis=0)


def het_gnn_forward_batch(prepped, c_text, c_other, u_text, u_other, p_text, p_image):
    """Batched over het_nodes.  c_*: (nb, 1, D); u_*: (nb, Nu, D); p_*: (nb, Np, D).
    One fused pallas_call; the grid iterates over blocks of nodes ("parallel").
    Returns (nb, 1, outemb_d)."""
    nb = c_text.shape[0]
    nu = u_text.shape[1]
    n_post = p_text.shape[1]

    blk = min(((nb + 7) // 8) * 8, NODE_BLK_MAX)      # nodes per grid step, multiple of 8
    nb_pad = ((nb + blk - 1) // blk) * blk            # pad with zero-nodes (sliced off at the end)
    nbk = nb_pad // blk

    def prep(x, rows_per_node):
        x = _pad_nodes(x, nb_pad)                     # (nb_pad, rows_per_node, D)
        return x.reshape(nbk, blk * rows_per_node, x.shape[-1])

    # Per-block row layout: [c rows (blk) | user rows (blk*Nu) | post rows (blk*Np)], so each
    # modality's folded init-Linear+LSTM is a single tall matmul inside the kernel.
    text_all = jnp.concatenate([prep(c_text, 1), prep(u_text, nu), prep(p_text, n_post)], axis=1)
    other_all = jnp.concatenate([prep(c_other, 1), prep(u_other, nu)], axis=1)
    image_all = prep(p_image, n_post)

    mean_u = _block_mean_matrix(blk, nu)
    mean_p = _block_mean_matrix(blk, n_post)

    kernel = functools.partial(het_gnn_kernel, blk=blk, n_user=nu, n_post=n_post,
                               hidden=HIDDEN, u_hidden=U_HIDDEN, p_hidden=P_HIDDEN)

    def node_spec(arr):
        return pl.BlockSpec((1,) + arr.shape[1:], lambda n: (n, 0, 0))

    def shared_spec(arr):
        return pl.BlockSpec(arr.shape, lambda n, nd=arr.ndim: (0,) * nd)

    shared = (mean_u, mean_p) + tuple(prepped)
    in_specs = [node_spec(text_all), node_spec(other_all), node_spec(image_all)]
    in_specs += [shared_spec(a) for a in shared]

    out = pl.pallas_call(
        kernel,
        grid=(nbk,),
        in_specs=in_specs,
        out_specs=pl.BlockSpec((1, blk, OUTEMB_D), lambda n: (n, 0, 0)),
        out_shape=jax.ShapeDtypeStruct((nbk, blk, OUTEMB_D), jnp.float32),
        compiler_params=pltpu.CompilerParams(dimension_semantics=("parallel",)),
    )(text_all, other_all, image_all, *shared)

    return out.reshape(nb_pad, 1, OUTEMB_D)[:nb]


def het_gnn_forward(prepped, c_text, c_other, u_text, u_other, p_text, p_image):
    """Single het_node forward (== Het_GNN.forward).  c_*: (1, D); u_*: (Nu, D); p_*: (Np, D).
    Returns (1, 1, outemb_d) like the PyTorch module."""
    return het_gnn_forward_batch(prepped, c_text[None], c_other[None], u_text[None],
                                 u_other[None], p_text[None], p_image[None])


# ----------------------------- parameters (PyTorch layout) -----------------------------
def make_raw_params(key):
    """PyTorch-layout params: Linear weights stored (in, out); LSTM per-direction input weights
    W_ih^T stored (in, 4H) in PyTorch gate order (i, f, g, o); the two LSTM biases pre-summed
    (b_ih + b_hh) into one (1, 4H) row.  Attention vector is ones, as in __init__."""
    keys = iter(jax.random.split(key, 64))

    def nrm(shape, scale=0.1):
        return scale * jax.random.normal(next(keys), shape, dtype=jnp.float32)

    def linear(din, dout):
        return (nrm((din, dout)), nrm((1, dout)))

    def bilstm(din, h):
        return (nrm((din, 4 * h)), nrm((1, 4 * h)),     # forward direction: W, b
                nrm((din, 4 * h)), nrm((1, 4 * h)))     # reverse direction: W, b

    return {
        "text_linear": linear(D_TEXT, INI_TEXT),    "text_lstm": bilstm(INI_TEXT, HIDDEN),
        "image_linear": linear(D_IMAGE, INI_IMAGE), "image_lstm": bilstm(INI_IMAGE, HIDDEN),
        "other_linear": linear(D_OTHER, INI_OTHER), "other_lstm": bilstm(INI_OTHER, HIDDEN),
        "u_init_linear": linear(U_INPUT, U_INI),    "u_lstm": bilstm(U_INI, U_HIDDEN),
        "u_linear": linear(2 * U_HIDDEN, U_OUT),
        "p_init_linear": linear(P_INPUT, P_INI),    "p_lstm": bilstm(P_INI, P_HIDDEN),
        "p_linear": linear(2 * P_HIDDEN, P_OUT),
        "u_neigh_att": jnp.ones((2 * EMBED_D, 1), jnp.float32),
        "out_linear": linear(OUT_EMBED_D, OUTEMB_D),
    }


_HP = jax.lax.Precision.HIGHEST


def _pack_bilstm_gates(lstm, hidden):
    """Drop the forget gate (c0 == 0, seq_len == 1) and pack fwd+rev gates into one matrix
    with column layout [i_f, i_r | g_f, g_r | o_f, o_r] -> (din, 6*hidden)."""
    w_f, b_f, w_r, b_r = lstm
    h = hidden

    def split(w):
        return w[:, 0 * h:1 * h], w[:, 2 * h:3 * h], w[:, 3 * h:4 * h]   # i, g, o

    i_f, g_f, o_f = split(w_f)
    i_r, g_r, o_r = split(w_r)
    bi_f, bg_f, bo_f = split(b_f)
    bi_r, bg_r, bo_r = split(b_r)
    w = jnp.concatenate([i_f, i_r, g_f, g_r, o_f, o_r], axis=1)
    b = jnp.concatenate([bi_f, bi_r, bg_f, bg_r, bo_f, bo_r], axis=1)
    return w, b


def _fold(linear, lstm, hidden):
    """(x W_l + b_l) W_g + b_g == x (W_l W_g) + (b_l W_g + b_g) -- exact, all-linear fold."""
    w_l, b_l = linear
    w_g, b_g = _pack_bilstm_gates(lstm, hidden)
    return jnp.dot(w_l, w_g, precision=_HP), jnp.dot(b_l, w_g, precision=_HP) + b_g


def prepare_params(raw):
    """One-time JAX-side weight prep; returns the flat tuple of kernel weight operands."""
    w_text, b_text = _fold(raw["text_linear"], raw["text_lstm"], HIDDEN)
    w_image, b_image = _fold(raw["image_linear"], raw["image_lstm"], HIDDEN)
    w_other, b_other = _fold(raw["other_linear"], raw["other_lstm"], HIDDEN)
    w_u, b_u = _fold(raw["u_init_linear"], raw["u_lstm"], U_HIDDEN)
    w_p, b_p = _fold(raw["p_init_linear"], raw["p_lstm"], P_HIDDEN)
    w_uo, b_uo = raw["u_linear"]
    w_po, b_po = raw["p_linear"]
    att = raw["u_neigh_att"]                      # (2E, 1)
    att_top = att[:EMBED_D].T                     # (1, E)
    att_bot = att[EMBED_D:].T                     # (1, E)
    w_out, b_out = raw["out_linear"]
    return (w_text, b_text, w_image, b_image, w_other, b_other,
            w_u, b_u, w_uo, b_uo, w_p, b_p, w_po, b_po,
            att_top, att_bot, w_out, b_out)


# ----------------------------- pure-JAX reference (un-folded, un-packed) -----------------------------
def reference_forward(raw, c_text, c_other, u_text, u_other, p_text, p_image):
    """Direct transcription of the PyTorch forward (seq_len == 1, zero init state)."""
    def lin(x, p):
        w, b = p
        return jnp.dot(x, w, precision=_HP) + b

    def bilstm(x, lstm, h):
        def one(w, b):
            g = jnp.dot(x, w, precision=_HP) + b
            i = _sigmoid(g[:, 0:h])
            # forget gate multiplies c0 == 0
            gg = jnp.tanh(g[:, 2 * h:3 * h])
            o = _sigmoid(g[:, 3 * h:4 * h])
            return o * jnp.tanh(i * gg)
        w_f, b_f, w_r, b_r = lstm
        return jnp.concatenate([one(w_f, b_f), one(w_r, b_r)], axis=1)

    def bi_rnn(xa, lin_a, lstm_a, xb, lin_b, lstm_b):
        return 0.5 * (bilstm(lin(xa, lin_a), lstm_a, HIDDEN)
                      + bilstm(lin(xb, lin_b), lstm_b, HIDDEN))

    c_agg = bi_rnn(c_text, raw["text_linear"], raw["text_lstm"],
                   c_other, raw["other_linear"], raw["other_lstm"])
    u_content = bi_rnn(u_text, raw["text_linear"], raw["text_lstm"],
                       u_other, raw["other_linear"], raw["other_lstm"])
    p_content = bi_rnn(p_text, raw["text_linear"], raw["text_lstm"],
                       p_image, raw["image_linear"], raw["image_lstm"])

    def samet(content, lin_p, lstm_p, out_p, h):
        last = lin(bilstm(lin(content, lin_p), lstm_p, h), out_p)   # dropout == identity (eval)
        return jnp.mean(last, axis=0, keepdims=True)

    u_agg = samet(u_content, raw["u_init_linear"], raw["u_lstm"], raw["u_linear"], U_HIDDEN)
    p_agg = samet(p_content, raw["p_init_linear"], raw["p_lstm"], raw["p_linear"], P_HIDDEN)

    emb = jnp.concatenate([c_agg, u_agg, p_agg], axis=0)                    # (3, E)
    cat = jnp.concatenate([jnp.tile(c_agg, (3, 1)), emb], axis=1)           # (3, 2E)
    scores = jnp.dot(cat, raw["u_neigh_att"], precision=_HP)                # (3, 1)
    scores = jnp.where(scores >= 0.0, scores, 0.01 * scores)                # LeakyReLU(0.01)
    w = jax.nn.softmax(scores, axis=0)
    agg = jnp.sum(w * emb, axis=0, keepdims=True)                           # (1, E)
    w_o, b_o = raw["out_linear"]
    return _sigmoid(jnp.dot(agg, w_o, precision=_HP) + b_o).reshape(1, 1, OUTEMB_D)


# ----------------------------- demo -----------------------------
if __name__ == "__main__":
    key = jax.random.PRNGKey(0)
    k_par, k_in = jax.random.split(key)
    raw = make_raw_params(k_par)
    prepped = prepare_params(raw)

    # ---- single het_node (type 'user'), exactly like Het_GNN.forward(het_node) ----
    ks = jax.random.split(k_in, 7)
    c_text = jax.random.normal(ks[0], (1, D_TEXT), jnp.float32)
    c_other = jax.random.normal(ks[1], (1, D_OTHER), jnp.float32)
    u_text = jax.random.normal(ks[2], (N_USER_NEIGH, D_TEXT), jnp.float32)
    u_other = jax.random.normal(ks[3], (N_USER_NEIGH, D_OTHER), jnp.float32)
    p_text = jax.random.normal(ks[4], (N_POST_NEIGH, D_TEXT), jnp.float32)
    p_image = jax.random.normal(ks[5], (N_POST_NEIGH, D_IMAGE), jnp.float32)

    pred = het_gnn_forward(prepped, c_text, c_other, u_text, u_other, p_text, p_image)
    jax.block_until_ready(pred)
    assert pred.shape == (1, 1, OUTEMB_D)

    ref = reference_forward(raw, c_text, c_other, u_text, u_other, p_text, p_image)
    assert bool(jnp.allclose(pred, ref, atol=5e-3, rtol=1e-3)), "kernel/reference mismatch"

    # ---- a batch of het_nodes: one fused launch, node blocks gridded "parallel" ----
    nb = 8
    kb = jax.random.split(ks[6], 6)
    bc_text = jax.random.normal(kb[0], (nb, 1, D_TEXT), jnp.float32)
    bc_other = jax.random.normal(kb[1], (nb, 1, D_OTHER), jnp.float32)
    bu_text = jax.random.normal(kb[2], (nb, N_USER_NEIGH, D_TEXT), jnp.float32)
    bu_other = jax.random.normal(kb[3], (nb, N_USER_NEIGH, D_OTHER), jnp.float32)
    bp_text = jax.random.normal(kb[4], (nb, N_POST_NEIGH, D_TEXT), jnp.float32)
    bp_image = jax.random.normal(kb[5], (nb, N_POST_NEIGH, D_IMAGE), jnp.float32)

    preds = het_gnn_forward_batch(prepped, bc_text, bc_other, bu_text, bu_other,
                                  bp_text, bp_image)
    jax.block_until_ready(preds)
    assert preds.shape == (nb, 1, OUTEMB_D)

    refs = jnp.concatenate(
        [reference_forward(raw, bc_text[i], bc_other[i], bu_text[i], bu_other[i],
                           bp_text[i], bp_image[i]) for i in range(nb)], axis=0)   # (nb, 1, 8)
    assert bool(jnp.allclose(preds, refs, atol=5e-3, rtol=1e-3)), "batched kernel/reference mismatch"

    print("KERNEL_OK")
</pallas_src>

<mosaic_0001>
module attributes {stable_mosaic.version = 11 : i64} {
  func.func @het_gnn_kernel(%arg0: i32, %arg1: memref<1x72x16xf32, #tpu.memory_space<vmem>>, %arg2: memref<1x40x16xf32, #tpu.memory_space<vmem>>, %arg3: memref<1x32x16xf32, #tpu.memory_space<vmem>>, %arg4: memref<8x32xf32, #tpu.memory_space<vmem>>, %arg5: memref<8x32xf32, #tpu.memory_space<vmem>>, %arg6: memref<16x96xf32, #tpu.memory_space<vmem>>, %arg7: memref<1x96xf32, #tpu.memory_space<vmem>>, %arg8: memref<16x96xf32, #tpu.memory_space<vmem>>, %arg9: memref<1x96xf32, #tpu.memory_space<vmem>>, %arg10: memref<16x96xf32, #tpu.memory_space<vmem>>, %arg11: memref<1x96xf32, #tpu.memory_space<vmem>>, %arg12: memref<32x96xf32, #tpu.memory_space<vmem>>, %arg13: memref<1x96xf32, #tpu.memory_space<vmem>>, %arg14: memref<32x32xf32, #tpu.memory_space<vmem>>, %arg15: memref<1x32xf32, #tpu.memory_space<vmem>>, %arg16: memref<32x96xf32, #tpu.memory_space<vmem>>, %arg17: memref<1x96xf32, #tpu.memory_space<vmem>>, %arg18: memref<32x32xf32, #tpu.memory_space<vmem>>, %arg19: memref<1x32xf32, #tpu.memory_space<vmem>>, %arg20: memref<1x32xf32, #tpu.memory_space<vmem>>, %arg21: memref<1x32xf32, #tpu.memory_space<vmem>>, %arg22: memref<32x8xf32, #tpu.memory_space<vmem>>, %arg23: memref<1x8xf32, #tpu.memory_space<vmem>>, %arg24: memref<1x8x8xf32, #tpu.memory_space<vmem>>) attributes {dimension_semantics = [#tpu.dimension_semantics<parallel>], iteration_bounds = array<i64: 1>, scalar_prefetch = 0 : i64, scratch_operands = 0 : i64, tpu.core_type = #tpu.core_type<tc>, window_params = [{transform_indices = @transform_0, window_bounds = array<i64: 1, 72, 16>}, {transform_indices = @transform_1, window_bounds = array<i64: 1, 40, 16>}, {transform_indices = @transform_2, window_bounds = array<i64: 1, 32, 16>}, {pipeline_mode = #tpu.pipeline_mode<synchronous>, transform_indices = @transform_3, window_bounds = array<i64: 8, 32>}, {pipeline_mode = #tpu.pipeline_mode<synchronous>, transform_indices = @transform_4, window_bounds = array<i64: 8, 32>}, {pipeline_mode = #tpu.pipeline_mode<synchronous>, transform_indices = @transform_5, window_bounds = array<i64: 16, 96>}, {pipeline_mode = #tpu.pipeline_mode<synchronous>, transform_indices = @transform_6, window_bounds = array<i64: 1, 96>}, {pipeline_mode = #tpu.pipeline_mode<synchronous>, transform_indices = @transform_7, window_bounds = array<i64: 16, 96>}, {pipeline_mode = #tpu.pipeline_mode<synchronous>, transform_indices = @transform_8, window_bounds = array<i64: 1, 96>}, {pipeline_mode = #tpu.pipeline_mode<synchronous>, transform_indices = @transform_9, window_bounds = array<i64: 16, 96>}, {pipeline_mode = #tpu.pipeline_mode<synchronous>, transform_indices = @transform_10, window_bounds = array<i64: 1, 96>}, {pipeline_mode = #tpu.pipeline_mode<synchronous>, transform_indices = @transform_11, window_bounds = array<i64: 32, 96>}, {pipeline_mode = #tpu.pipeline_mode<synchronous>, transform_indices = @transform_12, window_bounds = array<i64: 1, 96>}, {pipeline_mode = #tpu.pipeline_mode<synchronous>, transform_indices = @transform_13, window_bounds = array<i64: 32, 32>}, {pipeline_mode = #tpu.pipeline_mode<synchronous>, transform_indices = @transform_14, window_bounds = array<i64: 1, 32>}, {pipeline_mode = #tpu.pipeline_mode<synchronous>, transform_indices = @transform_15, window_bounds = array<i64: 32, 96>}, {pipeline_mode = #tpu.pipeline_mode<synchronous>, transform_indices = @transform_16, window_bounds = array<i64: 1, 96>}, {pipeline_mode = #tpu.pipeline_mode<synchronous>, transform_indices = @transform_17, window_bounds = array<i64: 32, 32>}, {pipeline_mode = #tpu.pipeline_mode<synchronous>, transform_indices = @transform_18, window_bounds = array<i64: 1, 32>}, {pipeline_mode = #tpu.pipeline_mode<synchronous>, transform_indices = @transform_19, window_bounds = array<i64: 1, 32>}, {pipeline_mode = #tpu.pipeline_mode<synchronous>, transform_indices = @transform_20, window_bounds = array<i64: 1, 32>}, {pipeline_mode = #tpu.pipeline_mode<synchronous>, transform_indices = @transform_21, window_bounds = array<i64: 32, 8>}, {pipeline_mode = #tpu.pipeline_mode<synchronous>, transform_indices = @transform_22, window_bounds = array<i64: 1, 8>}, {transform_indices = @transform_23, window_bounds = array<i64: 1, 8, 8>}]} {
    %c0 = arith.constant 0 : index
    %c0_0 = arith.constant 0 : index
    %c0_1 = arith.constant 0 : index
    %0 = vector.load %arg1[%c0, %c0_0, %c0_1] : memref<1x72x16xf32, #tpu.memory_space<vmem>>, vector<1x72x16xf32>
    %1 = vector.shape_cast %0 : vector<1x72x16xf32> to vector<72x16xf32>
    %c0_2 = arith.constant 0 : index
    %c0_3 = arith.constant 0 : index
    %2 = vector.load %arg6[%c0_2, %c0_3] : memref<16x96xf32, #tpu.memory_space<vmem>>, vector<16x96xf32>
    %cst = arith.constant dense<0.000000e+00> : vector<72x96xf32>
    %3 = tpu.matmul %1, %2, %cst {dimension_numbers = #tpu.dot_dimension_numbers<[1], [0], [0], [1], [0, 0, 1, 1], [], []>} : vector<72x16xf32>, vector<16x96xf32>, vector<72x96xf32> -> vector<72x96xf32>
    %c0_4 = arith.constant 0 : index
    %c0_5 = arith.constant 0 : index
    %4 = vector.load %arg7[%c0_4, %c0_5] : memref<1x96xf32, #tpu.memory_space<vmem>>, vector<1x96xf32>
    %5 = vector.broadcast %4 : vector<1x96xf32> to vector<72x96xf32>
    %6 = arith.addf %3, %5 : vector<72x96xf32>
    %7 = vector.extract_strided_slice %6 {offsets = [0, 0], sizes = [72, 32], strides = [1, 1]} : vector<72x96xf32> to vector<72x32xf32>
    %cst_6 = arith.constant 0.000000e+00 : f32
    %8 = vector.broadcast %cst_6 : f32 to vector<72x32xf32>
    %9 = arith.subf %8, %7 : vector<72x32xf32>
    %10 = math.exp %9 : vector<72x32xf32>
    %cst_7 = arith.constant 1.000000e+00 : f32
    %11 = vector.broadcast %cst_7 : f32 to vector<72x32xf32>
    %12 = arith.addf %11, %10 : vector<72x32xf32>
    %cst_8 = arith.constant 1.000000e+00 : f32
    %13 = vector.broadcast %cst_8 : f32 to vector<72x32xf32>
    %14 = arith.divf %13, %12 : vector<72x32xf32>
    %15 = vector.extract_strided_slice %6 {offsets = [0, 32], sizes = [72, 32], strides = [1, 1]} : vector<72x96xf32> to vector<72x32xf32>
    %16 = math.tanh %15 : vector<72x32xf32>
    %17 = vector.extract_strided_slice %6 {offsets = [0, 64], sizes = [72, 32], strides = [1, 1]} : vector<72x96xf32> to vector<72x32xf32>
    %cst_9 = arith.constant 0.000000e+00 : f32
    %18 = vector.broadcast %cst_9 : f32 to vector<72x32xf32>
    %19 = arith.subf %18, %17 : vector<72x32xf32>
    %20 = math.exp %19 : vector<72x32xf32>
    %cst_10 = arith.constant 1.000000e+00 : f32
    %21 = vector.broadcast %cst_10 : f32 to vector<72x32xf32>
    %22 = arith.addf %21, %20 : vector<72x32xf32>
    %cst_11 = arith.constant 1.000000e+00 : f32
    %23 = vector.broadcast %cst_11 : f32 to vector<72x32xf32>
    %24 = arith.divf %23, %22 : vector<72x32xf32>
    %25 = arith.mulf %14, %16 : vector<72x32xf32>
    %26 = math.tanh %25 : vector<72x32xf32>
    %27 = arith.mulf %24, %26 : vector<72x32xf32>
    %c0_12 = arith.constant 0 : index
    %c0_13 = arith.constant 0 : index
    %c0_14 = arith.constant 0 : index
    %28 = vector.load %arg2[%c0_12, %c0_13, %c0_14] : memref<1x40x16xf32, #tpu.memory_space<vmem>>, vector<1x40x16xf32>
    %29 = vector.shape_cast %28 : vector<1x40x16xf32> to vector<40x16xf32>
    %c0_15 = arith.constant 0 : index
    %c0_16 = arith.constant 0 : index
    %30 = vector.load %arg10[%c0_15, %c0_16] : memref<16x96xf32, #tpu.memory_space<vmem>>, vector<16x96xf32>
    %cst_17 = arith.constant dense<0.000000e+00> : vector<40x96xf32>
    %31 = tpu.matmul %29, %30, %cst_17 {dimension_numbers = #tpu.dot_dimension_numbers<[1], [0], [0], [1], [0, 0, 1, 1], [], []>} : vector<40x16xf32>, vector<16x96xf32>, vector<40x96xf32> -> vector<40x96xf32>
    %c0_18 = arith.constant 0 : index
    %c0_19 = arith.constant 0 : index
    %32 = vector.load %arg11[%c0_18, %c0_19] : memref<1x96xf32, #tpu.memory_space<vmem>>, vector<1x96xf32>
    %33 = vector.broadcast %32 : vector<1x96xf32> to vector<40x96xf32>
    %34 = arith.addf %31, %33 : vector<40x96xf32>
    %35 = vector.extract_strided_slice %34 {offsets = [0, 0], sizes = [40, 32], strides = [1, 1]} : vector<40x96xf32> to vector<40x32xf32>
    %cst_20 = arith.constant 0.000000e+00 : f32
    %36 = vector.broadcast %cst_20 : f32 to vector<40x32xf32>
    %37 = arith.subf %36, %35 : vector<40x32xf32>
    %38 = math.exp %37 : vector<40x32xf32>
    %cst_21 = arith.constant 1.000000e+00 : f32
    %39 = vector.broadcast %cst_21 : f32 to vector<40x32xf32>
    %40 = arith.addf %39, %38 : vector<40x32xf32>
    %cst_22 = arith.constant 1.000000e+00 : f32
    %41 = vector.broadcast %cst_22 : f32 to vector<40x32xf32>
    %42 = arith.divf %41, %40 : vector<40x32xf32>
    %43 = vector.extract_strided_slice %34 {offsets = [0, 32], sizes = [40, 32], strides = [1, 1]} : vector<40x96xf32> to vector<40x32xf32>
    %44 = math.tanh %43 : vector<40x32xf32>
    %45 = vector.extract_strided_slice %34 {offsets = [0, 64], sizes = [40, 32], strides = [1, 1]} : vector<40x96xf32> to vector<40x32xf32>
    %cst_23 = arith.constant 0.000000e+00 : f32
    %46 = vector.broadcast %cst_23 : f32 to vector<40x32xf32>
    %47 = arith.subf %46, %45 : vector<40x32xf32>
    %48 = math.exp %47 : vector<40x32xf32>
    %cst_24 = arith.constant 1.000000e+00 : f32
    %49 = vector.broadcast %cst_24 : f32 to vector<40x32xf32>
    %50 = arith.addf %49, %48 : vector<40x32xf32>
    %cst_25 = arith.constant 1.000000e+00 : f32
    %51 = vector.broadcast %cst_25 : f32 to vector<40x32xf32>
    %52 = arith.divf %51, %50 : vector<40x32xf32>
    %53 = arith.mulf %42, %44 : vector<40x32xf32>
    %54 = math.tanh %53 : vector<40x32xf32>
    %55 = arith.mulf %52, %54 : vector<40x32xf32>
    %c0_26 = arith.constant 0 : index
    %c0_27 = arith.constant 0 : index
    %c0_28 = arith.constant 0 : index
    %56 = vector.load %arg3[%c0_26, %c0_27, %c0_28] : memref<1x32x16xf32, #tpu.memory_space<vmem>>, vector<1x32x16xf32>
    %57 = vector.shape_cast %56 : vector<1x32x16xf32> to vector<32x16xf32>
    %c0_29 = arith.constant 0 : index
    %c0_30 = arith.constant 0 : index
    %58 = vector.load %arg8[%c0_29, %c0_30] : memref<16x96xf32, #tpu.memory_space<vmem>>, vector<16x96xf32>
    %cst_31 = arith.constant dense<0.000000e+00> : vector<32x96xf32>
    %59 = tpu.matmul %57, %58, %cst_31 {dimension_numbers = #tpu.dot_dimension_numbers<[1], [0], [0], [1], [0, 0, 1, 1], [], []>} : vector<32x16xf32>, vector<16x96xf32>, vector<32x96xf32> -> vector<32x96xf32>
    %c0_32 = arith.constant 0 : index
    %c0_33 = arith.constant 0 : index
    %60 = vector.load %arg9[%c0_32, %c0_33] : memref<1x96xf32, #tpu.memory_space<vmem>>, vector<1x96xf32>
    %61 = vector.broadcast %60 : vector<1x96xf32> to vector<32x96xf32>
    %62 = arith.addf %59, %61 : vector<32x96xf32>
    %63 = vector.extract_strided_slice %62 {offsets = [0, 0], sizes = [32, 32], strides = [1, 1]} : vector<32x96xf32> to vector<32x32xf32>
    %cst_34 = arith.constant 0.000000e+00 : f32
    %64 = vector.broadcast %cst_34 : f32 to vector<32x32xf32>
    %65 = arith.subf %64, %63 : vector<32x32xf32>
    %66 = math.exp %65 : vector<32x32xf32>
    %cst_35 = arith.constant 1.000000e+00 : f32
    %67 = vector.broadcast %cst_35 : f32 to vector<32x32xf32>
    %68 = arith.addf %67, %66 : vector<32x32xf32>
    %cst_36 = arith.constant 1.000000e+00 : f32
    %69 = vector.broadcast %cst_36 : f32 to vector<32x32xf32>
    %70 = arith.divf %69, %68 : vector<32x32xf32>
    %71 = vector.extract_strided_slice %62 {offsets = [0, 32], sizes = [32, 32], strides = [1, 1]} : vector<32x96xf32> to vector<32x32xf32>
    %72 = math.tanh %71 : vector<32x32xf32>
    %73 = vector.extract_strided_slice %62 {offsets = [0, 64], sizes = [32, 32], strides = [1, 1]} : vector<32x96xf32> to vector<32x32xf32>
    %cst_37 = arith.constant 0.000000e+00 : f32
    %74 = vector.broadcast %cst_37 : f32 to vector<32x32xf32>
    %75 = arith.subf %74, %73 : vector<32x32xf32>
    %76 = math.exp %75 : vector<32x32xf32>
    %cst_38 = arith.constant 1.000000e+00 : f32
    %77 = vector.broadcast %cst_38 : f32 to vector<32x32xf32>
    %78 = arith.addf %77, %76 : vector<32x32xf32>
    %cst_39 = arith.constant 1.000000e+00 : f32
    %79 = vector.broadcast %cst_39 : f32 to vector<32x32xf32>
    %80 = arith.divf %79, %78 : vector<32x32xf32>
    %81 = arith.mulf %70, %72 : vector<32x32xf32>
    %82 = math.tanh %81 : vector<32x32xf32>
    %83 = arith.mulf %80, %82 : vector<32x32xf32>
    %84 = vector.extract_strided_slice %27 {offsets = [0, 0], sizes = [8, 32], strides = [1, 1]} : vector<72x32xf32> to vector<8x32xf32>
    %85 = vector.extract_strided_slice %55 {offsets = [0, 0], sizes = [8, 32], strides = [1, 1]} : vector<40x32xf32> to vector<8x32xf32>
    %86 = arith.addf %84, %85 : vector<8x32xf32>
    %cst_40 = arith.constant 5.000000e-01 : f32
    %87 = vector.broadcast %cst_40 : f32 to vector<8x32xf32>
    %88 = arith.mulf %87, %86 : vector<8x32xf32>
    %89 = vector.extract_strided_slice %27 {offsets = [8, 0], sizes = [32, 32], strides = [1, 1]} : vector<72x32xf32> to vector<32x32xf32>
    %90 = vector.extract_strided_slice %55 {offsets = [8, 0], sizes = [32, 32], strides = [1, 1]} : vector<40x32xf32> to vector<32x32xf32>
    %91 = arith.addf %89, %90 : vector<32x32xf32>
    %cst_41 = arith.constant 5.000000e-01 : f32
    %92 = vector.broadcast %cst_41 : f32 to vector<32x32xf32>
    %93 = arith.mulf %92, %91 : vector<32x32xf32>
    %94 = vector.extract_strided_slice %27 {offsets = [40, 0], sizes = [32, 32], strides = [1, 1]} : vector<72x32xf32> to vector<32x32xf32>
    %95 = arith.addf %94, %83 : vector<32x32xf32>
    %cst_42 = arith.constant 5.000000e-01 : f32
    %96 = vector.broadcast %cst_42 : f32 to vector<32x32xf32>
    %97 = arith.mulf %96, %95 : vector<32x32xf32>
    %c0_43 = arith.constant 0 : index
    %c0_44 = arith.constant 0 : index
    %98 = vector.load %arg12[%c0_43, %c0_44] : memref<32x96xf32, #tpu.memory_space<vmem>>, vector<32x96xf32>
    %cst_45 = arith.constant dense<0.000000e+00> : vector<32x96xf32>
    %99 = tpu.matmul %93, %98, %cst_45 {dimension_numbers = #tpu.dot_dimension_numbers<[1], [0], [0], [1], [0, 0, 1, 1], [], []>} : vector<32x32xf32>, vector<32x96xf32>, vector<32x96xf32> -> vector<32x96xf32>
    %c0_46 = arith.constant 0 : index
    %c0_47 = arith.constant 0 : index
    %100 = vector.load %arg13[%c0_46, %c0_47] : memref<1x96xf32, #tpu.memory_space<vmem>>, vector<1x96xf32>
    %101 = vector.broadcast %100 : vector<1x96xf32> to vector<32x96xf32>
    %102 = arith.addf %99, %101 : vector<32x96xf32>
    %103 = vector.extract_strided_slice %102 {offsets = [0, 0], sizes = [32, 32], strides = [1, 1]} : vector<32x96xf32> to vector<32x32xf32>
    %cst_48 = arith.constant 0.000000e+00 : f32
    %104 = vector.broadcast %cst_48 : f32 to vector<32x32xf32>
    %105 = arith.subf %104, %103 : vector<32x32xf32>
    %106 = math.exp %105 : vector<32x32xf32>
    %cst_49 = arith.constant 1.000000e+00 : f32
    %107 = vector.broadcast %cst_49 : f32 to vector<32x32xf32>
    %108 = arith.addf %107, %106 : vector<32x32xf32>
    %cst_50 = arith.constant 1.000000e+00 : f32
    %109 = vector.broadcast %cst_50 : f32 to vector<32x32xf32>
    %110 = arith.divf %109, %108 : vector<32x32xf32>
    %111 = vector.extract_strided_slice %102 {offsets = [0, 32], sizes = [32, 32], strides = [1, 1]} : vector<32x96xf32> to vector<32x32xf32>
    %112 = math.tanh %111 : vector<32x32xf32>
    %113 = vector.extract_strided_slice %102 {offsets = [0, 64], sizes = [32, 32], strides = [1, 1]} : vector<32x96xf32> to vector<32x32xf32>
    %cst_51 = arith.constant 0.000000e+00 : f32
    %114 = vector.broadcast %cst_51 : f32 to vector<32x32xf32>
    %115 = arith.subf %114, %113 : vector<32x32xf32>
    %116 = math.exp %115 : vector<32x32xf32>
    %cst_52 = arith.constant 1.000000e+00 : f32
    %117 = vector.broadcast %cst_52 : f32 to vector<32x32xf32>
    %118 = arith.addf %117, %116 : vector<32x32xf32>
    %cst_53 = arith.constant 1.000000e+00 : f32
    %119 = vector.broadcast %cst_53 : f32 to vector<32x32xf32>
    %120 = arith.divf %119, %118 : vector<32x32xf32>
    %121 = arith.mulf %110, %112 : vector<32x32xf32>
    %122 = math.tanh %121 : vector<32x32xf32>
    %123 = arith.mulf %120, %122 : vector<32x32xf32>
    %c0_54 = arith.constant 0 : index
    %c0_55 = arith.constant 0 : index
    %124 = vector.load %arg4[%c0_54, %c0_55] : memref<8x32xf32, #tpu.memory_space<vmem>>, vector<8x32xf32>
    %cst_56 = arith.constant dense<0.000000e+00> : vector<8x32xf32>
    %125 = tpu.matmul %124, %123, %cst_56 {dimension_numbers = #tpu.dot_dimension_numbers<[1], [0], [0], [1], [0, 0, 1, 1], [], []>} : vector<8x32xf32>, vector<32x32xf32>, vector<8x32xf32> -> vector<8x32xf32>
    %c0_57 = arith.constant 0 : index
    %c0_58 = arith.constant 0 : index
    %126 = vector.load %arg14[%c0_57, %c0_58] : memref<32x32xf32, #tpu.memory_space<vmem>>, vector<32x32xf32>
    %cst_59 = arith.constant dense<0.000000e+00> : vector<8x32xf32>
    %127 = tpu.matmul %125, %126, %cst_59 {dimension_numbers = #tpu.dot_dimension_numbers<[1], [0], [0], [1], [0, 0, 1, 1], [], []>} : vector<8x32xf32>, vector<32x32xf32>, vector<8x32xf32> -> vector<8x32xf32>
    %c0_60 = arith.constant 0 : index
    %c0_61 = arith.constant 0 : index
    %128 = vector.load %arg15[%c0_60, %c0_61] : memref<1x32xf32, #tpu.memory_space<vmem>>, vector<1x32xf32>
    %129 = vector.broadcast %128 : vector<1x32xf32> to vector<8x32xf32>
    %130 = arith.addf %127, %129 : vector<8x32xf32>
    %c0_62 = arith.constant 0 : index
    %c0_63 = arith.constant 0 : index
    %131 = vector.load %arg16[%c0_62, %c0_63] : memref<32x96xf32, #tpu.memory_space<vmem>>, vector<32x96xf32>
    %cst_64 = arith.constant dense<0.000000e+00> : vector<32x96xf32>
    %132 = tpu.matmul %97, %131, %cst_64 {dimension_numbers = #tpu.dot_dimension_numbers<[1], [0], [0], [1], [0, 0, 1, 1], [], []>} : vector<32x32xf32>, vector<32x96xf32>, vector<32x96xf32> -> vector<32x96xf32>
    %c0_65 = arith.constant 0 : index
    %c0_66 = arith.constant 0 : index
    %133 = vector.load %arg17[%c0_65, %c0_66] : memref<1x96xf32, #tpu.memory_space<vmem>>, vector<1x96xf32>
    %134 = vector.broadcast %133 : vector<1x96xf32> to vector<32x96xf32>
    %135 = arith.addf %132, %134 : vector<32x96xf32>
    %136 = vector.extract_strided_slice %135 {offsets = [0, 0], sizes = [32, 32], strides = [1, 1]} : vector<32x96xf32> to vector<32x32xf32>
    %cst_67 = arith.constant 0.000000e+00 : f32
    %137 = vector.broadcast %cst_67 : f32 to vector<32x32xf32>
    %138 = arith.subf %137, %136 : vector<32x32xf32>
    %139 = math.exp %138 : vector<32x32xf32>
    %cst_68 = arith.constant 1.000000e+00 : f32
    %140 = vector.broadcast %cst_68 : f32 to vector<32x32xf32>
    %141 = arith.addf %140, %139 : vector<32x32xf32>
    %cst_69 = arith.constant 1.000000e+00 : f32
    %142 = vector.broadcast %cst_69 : f32 to vector<32x32xf32>
    %143 = arith.divf %142, %141 : vector<32x32xf32>
    %144 = vector.extract_strided_slice %135 {offsets = [0, 32], sizes = [32, 32], strides = [1, 1]} : vector<32x96xf32> to vector<32x32xf32>
    %145 = math.tanh %144 : vector<32x32xf32>
    %146 = vector.extract_strided_slice %135 {offsets = [0, 64], sizes = [32, 32], strides = [1, 1]} : vector<32x96xf32> to vector<32x32xf32>
    %cst_70 = arith.constant 0.000000e+00 : f32
    %147 = vector.broadcast %cst_70 : f32 to vector<32x32xf32>
    %148 = arith.subf %147, %146 : vector<32x32xf32>
    %149 = math.exp %148 : vector<32x32xf32>
    %cst_71 = arith.constant 1.000000e+00 : f32
    %150 = vector.broadcast %cst_71 : f32 to vector<32x32xf32>
    %151 = arith.addf %150, %149 : vector<32x32xf32>
    %cst_72 = arith.constant 1.000000e+00 : f32
    %152 = vector.broadcast %cst_72 : f32 to vector<32x32xf32>
    %153 = arith.divf %152, %151 : vector<32x32xf32>
    %154 = arith.mulf %143, %145 : vector<32x32xf32>
    %155 = math.tanh %154 : vector<32x32xf32>
    %156 = arith.mulf %153, %155 : vector<32x32xf32>
    %c0_73 = arith.constant 0 : index
    %c0_74 = arith.constant 0 : index
    %157 = vector.load %arg5[%c0_73, %c0_74] : memref<8x32xf32, #tpu.memory_space<vmem>>, vector<8x32xf32>
    %cst_75 = arith.constant dense<0.000000e+00> : vector<8x32xf32>
    %158 = tpu.matmul %157, %156, %cst_75 {dimension_numbers = #tpu.dot_dimension_numbers<[1], [0], [0], [1], [0, 0, 1, 1], [], []>} : vector<8x32xf32>, vector<32x32xf32>, vector<8x32xf32> -> vector<8x32xf32>
    %c0_76 = arith.constant 0 : index
    %c0_77 = arith.constant 0 : index
    %159 = vector.load %arg18[%c0_76, %c0_77] : memref<32x32xf32, #tpu.memory_space<vmem>>, vector<32x32xf32>
    %cst_78 = arith.constant dense<0.000000e+00> : vector<8x32xf32>
    %160 = tpu.matmul %158, %159, %cst_78 {dimension_numbers = #tpu.dot_dimension_numbers<[1], [0], [0], [1], [0, 0, 1, 1], [], []>} : vector<8x32xf32>, vector<32x32xf32>, vector<8x32xf32> -> vector<8x32xf32>
    %c0_79 = arith.constant 0 : index
    %c0_80 = arith.constant 0 : index
    %161 = vector.load %arg19[%c0_79, %c0_80] : memref<1x32xf32, #tpu.memory_space<vmem>>, vector<1x32xf32>
    %162 = vector.broadcast %161 : vector<1x32xf32> to vector<8x32xf32>
    %163 = arith.addf %160, %162 : vector<8x32xf32>
    %c0_81 = arith.constant 0 : index
    %c0_82 = arith.constant 0 : index
    %164 = vector.load %arg20[%c0_81, %c0_82] : memref<1x32xf32, #tpu.memory_space<vmem>>, vector<1x32xf32>
    %c0_83 = arith.constant 0 : index
    %c0_84 = arith.constant 0 : index
    %165 = vector.load %arg21[%c0_83, %c0_84] : memref<1x32xf32, #tpu.memory_space<vmem>>, vector<1x32xf32>
    %166 = vector.broadcast %164 : vector<1x32xf32> to vector<8x32xf32>
    %167 = arith.mulf %88, %166 : vector<8x32xf32>
    %cst_85 = arith.constant dense<0.000000e+00> : vector<8xf32>
    %168 = vector.multi_reduction <add>, %167, %cst_85 [1] : vector<8x32xf32> to vector<8xf32>
    %169 = vector.shape_cast %168 : vector<8xf32> to vector<8x1xf32>
    %170 = vector.broadcast %165 : vector<1x32xf32> to vector<8x32xf32>
    %171 = arith.mulf %88, %170 : vector<8x32xf32>
    %cst_86 = arith.constant dense<0.000000e+00> : vector<8xf32>
    %172 = vector.multi_reduction <add>, %171, %cst_86 [1] : vector<8x32xf32> to vector<8xf32>
    %173 = vector.shape_cast %172 : vector<8xf32> to vector<8x1xf32>
    %174 = arith.addf %169, %173 : vector<8x1xf32>
    %cst_87 = arith.constant 0.000000e+00 : f32
    %175 = vector.broadcast %cst_87 : f32 to vector<8x1xf32>
    %176 = arith.cmpf oge, %174, %175 : vector<8x1xf32>
    %cst_88 = arith.constant 0.00999999977 : f32
    %177 = vector.broadcast %cst_88 : f32 to vector<8x1xf32>
    %178 = arith.mulf %177, %174 : vector<8x1xf32>
    %179 = arith.select %176, %174, %178 : vector<8x1xi1>, vector<8x1xf32>
    %180 = vector.broadcast %165 : vector<1x32xf32> to vector<8x32xf32>
    %181 = arith.mulf %130, %180 : vector<8x32xf32>
    %cst_89 = arith.constant dense<0.000000e+00> : vector<8xf32>
    %182 = vector.multi_reduction <add>, %181, %cst_89 [1] : vector<8x32xf32> to vector<8xf32>
    %183 = vector.shape_cast %182 : vector<8xf32> to vector<8x1xf32>
    %184 = arith.addf %169, %183 : vector<8x1xf32>
    %cst_90 = arith.constant 0.000000e+00 : f32
    %185 = vector.broadcast %cst_90 : f32 to vector<8x1xf32>
    %186 = arith.cmpf oge, %184, %185 : vector<8x1xf32>
    %cst_91 = arith.constant 0.00999999977 : f32
    %187 = vector.broadcast %cst_91 : f32 to vector<8x1xf32>
    %188 = arith.mulf %187, %184 : vector<8x1xf32>
    %189 = arith.select %186, %184, %188 : vector<8x1xi1>, vector<8x1xf32>
    %190 = vector.broadcast %165 : vector<1x32xf32> to vector<8x32xf32>
    %191 = arith.mulf %163, %190 : vector<8x32xf32>
    %cst_92 = arith.constant dense<0.000000e+00> : vector<8xf32>
    %192 = vector.multi_reduction <add>, %191, %cst_92 [1] : vector<8x32xf32> to vector<8xf32>
    %193 = vector.shape_cast %192 : vector<8xf32> to vector<8x1xf32>
    %194 = arith.addf %169, %193 : vector<8x1xf32>
    %cst_93 = arith.constant 0.000000e+00 : f32
    %195 = vector.broadcast %cst_93 : f32 to vector<8x1xf32>
    %196 = arith.cmpf oge, %194, %195 : vector<8x1xf32>
    %cst_94 = arith.constant 0.00999999977 : f32
    %197 = vector.broadcast %cst_94 : f32 to vector<8x1xf32>
    %198 = arith.mulf %197, %194 : vector<8x1xf32>
    %199 = arith.select %196, %194, %198 : vector<8x1xi1>, vector<8x1xf32>
    %200 = arith.maximumf %179, %189 : vector<8x1xf32>
    %201 = arith.maximumf %200, %199 : vector<8x1xf32>
    %202 = arith.subf %179, %201 : vector<8x1xf32>
    %203 = math.exp %202 : vector<8x1xf32>
    %204 = arith.subf %189, %201 : vector<8x1xf32>
    %205 = math.exp %204 : vector<8x1xf32>
    %206 = arith.subf %199, %201 : vector<8x1xf32>
    %207 = math.exp %206 : vector<8x1xf32>
    %208 = vector.broadcast %203 : vector<8x1xf32> to vector<8x32xf32>
    %209 = arith.mulf %208, %88 : vector<8x32xf32>
    %210 = vector.broadcast %205 : vector<8x1xf32> to vector<8x32xf32>
    %211 = arith.mulf %210, %130 : vector<8x32xf32>
    %212 = arith.addf %209, %211 : vector<8x32xf32>
    %213 = vector.broadcast %207 : vector<8x1xf32> to vector<8x32xf32>
    %214 = arith.mulf %213, %163 : vector<8x32xf32>
    %215 = arith.addf %212, %214 : vector<8x32xf32>
    %216 = arith.addf %203, %205 : vector<8x1xf32>
    %217 = arith.addf %216, %207 : vector<8x1xf32>
    %218 = vector.broadcast %217 : vector<8x1xf32> to vector<8x32xf32>
    %219 = arith.divf %215, %218 : vector<8x32xf32>
    %c0_95 = arith.constant 0 : index
    %c0_96 = arith.constant 0 : index
    %220 = vector.load %arg22[%c0_95, %c0_96] : memref<32x8xf32, #tpu.memory_space<vmem>>, vector<32x8xf32>
    %cst_97 = arith.constant dense<0.000000e+00> : vector<8x8xf32>
    %221 = tpu.matmul %219, %220, %cst_97 {dimension_numbers = #tpu.dot_dimension_numbers<[1], [0], [0], [1], [0, 0, 1, 1], [], []>} : vector<8x32xf32>, vector<32x8xf32>, vector<8x8xf32> -> vector<8x8xf32>
    %c0_98 = arith.constant 0 : index
    %c0_99 = arith.constant 0 : index
    %222 = vector.load %arg23[%c0_98, %c0_99] : memref<1x8xf32, #tpu.memory_space<vmem>>, vector<1x8xf32>
    %223 = vector.broadcast %222 : vector<1x8xf32> to vector<8x8xf32>
    %224 = arith.addf %221, %223 : vector<8x8xf32>
    %cst_100 = arith.constant 0.000000e+00 : f32
    %225 = vector.broadcast %cst_100 : f32 to vector<8x8xf32>
    %226 = arith.subf %225, %224 : vector<8x8xf32>
    %227 = math.exp %226 : vector<8x8xf32>
    %cst_101 = arith.constant 1.000000e+00 : f32
    %228 = vector.broadcast %cst_101 : f32 to vector<8x8xf32>
    %229 = arith.addf %228, %227 : vector<8x8xf32>
    %cst_102 = arith.constant 1.000000e+00 : f32
    %230 = vector.broadcast %cst_102 : f32 to vector<8x8xf32>
    %231 = arith.divf %230, %229 : vector<8x8xf32>
    %c0_103 = arith.constant 0 : index
    %c0_104 = arith.constant 0 : index
    %c0_105 = arith.constant 0 : index
    %232 = vector.load %arg24[%c0_103, %c0_104, %c0_105] : memref<1x8x8xf32, #tpu.memory_space<vmem>>, vector<1x8x8xf32>
    %233 = vector.shape_cast %232 : vector<1x8x8xf32> to vector<8x8xf32>
    %234 = vector.shape_cast %231 : vector<8x8xf32> to vector<1x8x8xf32>
    tpu.vector_store %arg24[%c0_103, %c0_104, %c0_105], %234 {strides = array<i32>} : memref<1x8x8xf32, #tpu.memory_space<vmem>>, vector<1x8x8xf32>,
    return
  }
  func.func @transform_0(%arg0: i32) -> (i32, i32, i32) {
    %c0_i32 = arith.constant 0 : i32
    %c0_i32_0 = arith.constant 0 : i32
    %c0_i32_1 = arith.constant 0 : i32
    return %arg0, %c0_i32, %c0_i32_0 : i32, i32, i32
  }
  func.func @transform_1(%arg0: i32) -> (i32, i32, i32) {
    %c0_i32 = arith.constant 0 : i32
    %c0_i32_0 = arith.constant 0 : i32
    %c0_i32_1 = arith.constant 0 : i32
    return %arg0, %c0_i32, %c0_i32_0 : i32, i32, i32
  }
  func.func @transform_2(%arg0: i32) -> (i32, i32, i32) {
    %c0_i32 = arith.constant 0 : i32
    %c0_i32_0 = arith.constant 0 : i32
    %c0_i32_1 = arith.constant 0 : i32
    return %arg0, %c0_i32, %c0_i32_0 : i32, i32, i32
  }
  func.func @transform_3(%arg0: i32) -> (i32, i32) {
    %c0_i32 = arith.constant 0 : i32
    %c0_i32_0 = arith.constant 0 : i32
    %c0_i32_1 = arith.constant 0 : i32
    return %c0_i32, %c0_i32_0 : i32, i32
  }
  func.func @transform_4(%arg0: i32) -> (i32, i32) {
    %c0_i32 = arith.constant 0 : i32
    %c0_i32_0 = arith.constant 0 : i32
    %c0_i32_1 = arith.constant 0 : i32
    return %c0_i32, %c0_i32_0 : i32, i32
  }
  func.func @transform_5(%arg0: i32) -> (i32, i32) {
    %c0_i32 = arith.constant 0 : i32
    %c0_i32_0 = arith.constant 0 : i32
    %c0_i32_1 = arith.constant 0 : i32
    return %c0_i32, %c0_i32_0 : i32, i32
  }
  func.func @transform_6(%arg0: i32) -> (i32, i32) {
    %c0_i32 = arith.constant 0 : i32
    %c0_i32_0 = arith.constant 0 : i32
    %c0_i32_1 = arith.constant 0 : i32
    return %c0_i32, %c0_i32_0 : i32, i32
  }
  func.func @transform_7(%arg0: i32) -> (i32, i32) {
    %c0_i32 = arith.constant 0 : i32
    %c0_i32_0 = arith.constant 0 : i32
    %c0_i32_1 = arith.constant 0 : i32
    return %c0_i32, %c0_i32_0 : i32, i32
  }
  func.func @transform_8(%arg0: i32) -> (i32, i32) {
    %c0_i32 = arith.constant 0 : i32
    %c0_i32_0 = arith.constant 0 : i32
    %c0_i32_1 = arith.constant 0 : i32
    return %c0_i32, %c0_i32_0 : i32, i32
  }
  func.func @transform_9(%arg0: i32) -> (i32, i32) {
    %c0_i32 = arith.constant 0 : i32
    %c0_i32_0 = arith.constant 0 : i32
    %c0_i32_1 = arith.constant 0 : i32
    return %c0_i32, %c0_i32_0 : i32, i32
  }
  func.func @transform_10(%arg0: i32) -> (i32, i32) {
    %c0_i32 = arith.constant 0 : i32
    %c0_i32_0 = arith.constant 0 : i32
    %c0_i32_1 = arith.constant 0 : i32
    return %c0_i32, %c0_i32_0 : i32, i32
  }
  func.func @transform_11(%arg0: i32) -> (i32, i32) {
    %c0_i32 = arith.constant 0 : i32
    %c0_i32_0 = arith.constant 0 : i32
    %c0_i32_1 = arith.constant 0 : i32
    return %c0_i32, %c0_i32_0 : i32, i32
  }
  func.func @transform_12(%arg0: i32) -> (i32, i32) {
    %c0_i32 = arith.constant 0 : i32
    %c0_i32_0 = arith.constant 0 : i32
    %c0_i32_1 = arith.constant 0 : i32
    return %c0_i32, %c0_i32_0 : i32, i32
  }
  func.func @transform_13(%arg0: i32) -> (i32, i32) {
    %c0_i32 = arith.constant 0 : i32
    %c0_i32_0 = arith.constant 0 : i32
    %c0_i32_1 = arith.constant 0 : i32
    return %c0_i32, %c0_i32_0 : i32, i32
  }
  func.func @transform_14(%arg0: i32) -> (i32, i32) {
    %c0_i32 = arith.constant 0 : i32
    %c0_i32_0 = arith.constant 0 : i32
    %c0_i32_1 = arith.constant 0 : i32
    return %c0_i32, %c0_i32_0 : i32, i32
  }
  func.func @transform_15(%arg0: i32) -> (i32, i32) {
    %c0_i32 = arith.constant 0 : i32
    %c0_i32_0 = arith.constant 0 : i32
    %c0_i32_1 = arith.constant 0 : i32
    return %c0_i32, %c0_i32_0 : i32, i32
  }
  func.func @transform_16(%arg0: i32) -> (i32, i32) {
    %c0_i32 = arith.constant 0 : i32
    %c0_i32_0 = arith.constant 0 : i32
    %c0_i32_1 = arith.constant 0 : i32
    return %c0_i32, %c0_i32_0 : i32, i32
  }
  func.func @transform_17(%arg0: i32) -> (i32, i32) {
    %c0_i32 = arith.constant 0 : i32
    %c0_i32_0 = arith.constant 0 : i32
    %c0_i32_1 = arith.constant 0 : i32
    return %c0_i32, %c0_i32_0 : i32, i32
  }
  func.func @transform_18(%arg0: i32) -> (i32, i32) {
    %c0_i32 = arith.constant 0 : i32
    %c0_i32_0 = arith.constant 0 : i32
    %c0_i32_1 = arith.constant 0 : i32
    return %c0_i32, %c0_i32_0 : i32, i32
  }
  func.func @transform_19(%arg0: i32) -> (i32, i32) {
    %c0_i32 = arith.constant 0 : i32
    %c0_i32_0 = arith.constant 0 : i32
    %c0_i32_1 = arith.constant 0 : i32
    return %c0_i32, %c0_i32_0 : i32, i32
  }
  func.func @transform_20(%arg0: i32) -> (i32, i32) {
    %c0_i32 = arith.constant 0 : i32
    %c0_i32_0 = arith.constant 0 : i32
    %c0_i32_1 = arith.constant 0 : i32
    return %c0_i32, %c0_i32_0 : i32, i32
  }
  func.func @transform_21(%arg0: i32) -> (i32, i32) {
    %c0_i32 = arith.constant 0 : i32
    %c0_i32_0 = arith.constant 0 : i32
    %c0_i32_1 = arith.constant 0 : i32
    return %c0_i32, %c0_i32_0 : i32, i32
  }
  func.func @transform_22(%arg0: i32) -> (i32, i32) {
    %c0_i32 = arith.constant 0 : i32
    %c0_i32_0 = arith.constant 0 : i32
    %c0_i32_1 = arith.constant 0 : i32
    return %c0_i32, %c0_i32_0 : i32, i32
  }
  func.func @transform_23(%arg0: i32) -> (i32, i32, i32) {
    %c0_i32 = arith.constant 0 : i32
    %c0_i32_0 = arith.constant 0 : i32
    %c0_i32_1 = arith.constant 0 : i32
    return %arg0, %c0_i32, %c0_i32_0 : i32, i32, i32
  }
}

</mosaic_0001>

<bundles_post_ra>
// kernel: tpu_custom_call.1
= control target key start
LH: loop header
LB: loop body
LE: loop exit
PB: predicated region body
PF: predicated region fallthrough
CT: control target
= control target key end

     0   :  { %s2864_s0 = inlined_call_operand.vmem [shape: f32[1,72,16], index: 0, kind: input, shape index: {}]   ;;  %s2865_s1 = inlined_call_operand.vmem [shape: f32[1,40,16], index: 1, kind: input, shape index: {}]   ;;  %s2866_s2 = inlined_call_operand.vmem [shape: f32[1,32,16], index: 2, kind: input, shape index: {}]   ;;  %s2867_s3 = inlined_call_operand.vmem [shape: f32[8,32], index: 3, kind: input, shape index: {}]   ;;  %s2868_s4 = inlined_call_operand.vmem [shape: f32[8,32], index: 4, kind: input, shape index: {}]   ;;  %s2869_s5 = inlined_call_operand.vmem [shape: f32[16,96], index: 5, kind: input, shape index: {}]   ;;  %s2870_s6 = inlined_call_operand.vmem [shape: f32[1,96], index: 6, kind: input, shape index: {}]   ;;  %s2871_s7 = inlined_call_operand.vmem [shape: f32[16,96], index: 7, kind: input, shape index: {}]   ;;  %s2872_s8 = inlined_call_operand.vmem [shape: f32[1,96], index: 8, kind: input, shape index: {}]   ;;  %s2873_s9 = inlined_call_operand.vmem [shape: f32[16,96], index: 9, kind: input, shape index: {}]   ;;  %s2874_s10 = inlined_call_operand.vmem [shape: f32[1,96], index: 10, kind: input, shape index: {}]   ;;  %s2875_s11 = inlined_call_operand.vmem [shape: f32[32,96], index: 11, kind: input, shape index: {}]   ;;  %s2876_s12 = inlined_call_operand.vmem [shape: f32[1,96], index: 12, kind: input, shape index: {}]   ;;  %s2877_s13 = inlined_call_operand.vmem [shape: f32[32,32], index: 13, kind: input, shape index: {}]   ;;  %s2878_s14 = inlined_call_operand.vmem [shape: f32[1,32], index: 14, kind: input, shape index: {}]   ;;  %s2879_s15 = inlined_call_operand.vmem [shape: f32[32,96], index: 15, kind: input, shape index: {}]   ;;  %s2880_s16 = inlined_call_operand.vmem [shape: f32[1,96], index: 16, kind: input, shape index: {}]   ;;  %s2881_s17 = inlined_call_operand.vmem [shape: f32[32,32], index: 17, kind: input, shape index: {}]   ;;  %s2882_s18 = inlined_call_operand.vmem [shape: f32[1,32], index: 18, kind: input, shape index: {}]   ;;  %s2883_s19 = inlined_call_operand.vmem [shape: f32[1,32], index: 19, kind: input, shape index: {}]   ;;  %s2884_s20 = inlined_call_operand.vmem [shape: f32[1,32], index: 20, kind: input, shape index: {}]   ;;  %s2885_s21 = inlined_call_operand.vmem [shape: f32[32,8], index: 21, kind: input, shape index: {}]   ;;  %s2886_s22 = inlined_call_operand.vmem [shape: f32[1,8], index: 22, kind: input, shape index: {}]   ;;  %s2887_s23 = inlined_call_operand.hbm [shape: f32[1,8,8], index: 23, kind: output, shape index: {}]  }
   0x1   :  { %2894 = sst [smem:[#allocation5_spill]] %s2864_s0 }
   0x2   :  { %2895 = sst [smem:[#allocation6_spill]] %s2865_s1 }
   0x3   :  { %2896 = sst [smem:[#allocation7_spill]] %s2866_s2 }
   0x4   :  { %2897 = sst [smem:[#allocation8_spill]] %s2867_s3 }
   0x5   :  { %2898 = sst [smem:[#allocation9_spill]] %s2868_s4 }
   0x6   :  { %2899 = sst [smem:[#allocation10_spill]] %s2869_s5 }
   0x7   :  { %2900 = sst [smem:[#allocation11_spill]] %s2870_s6 }
   0x8   :  { %2901 = sst [smem:[#allocation12_spill]] %s2871_s7 }
   0x9   :  { %s2902_s24 = sld [smem:[#allocation10_spill]]  ;;  %v2294_v2 = vmov 0.0|0.0   ;;  %vm2295_vm0 = vmmov 0   ;;  %v2296_v4 = vmov 0.0   ;;  %v398_v5 = vld [vmem:[%s2873_s9] sm:$0xff]  ;;  %v399_v6 = vld [vmem:[%s2873_s9 + $0x8] sm:$0xff] }
   0xa   :  { %1967 = vmatprep.subr.bf16.mxu0 %v2294_v2  ;;  %1828 = vmatprep.mubr.msk.f32.mxu0 %vm2295_vm0, %v2296_v4  ;;  %v1971_v7 = vpack.c.bf16 %v399_v6, %v398_v5  ;;  %s2903_s28 = sld [smem:[#allocation5_spill]]  ;;  %vm93_vm1 = vcmask 130048   ;;  %s2904_s0 = sld [smem:[#allocation6_spill]] }
   0xb   :  { %1970 = vmatprep.subr.bf16.mxu1 %v2294_v2  ;;  %1859 = vmatprep.mubr.msk.f32.mxu1 %vm2295_vm0, %v2296_v4 }
   0xc   :  { %1972 = vmatpush3.bf16.msra.mxu1 %v1971_v7 }
   0xf   :  { %v84_v0 = vld [vmem:[%s2902_s24] sm:$0xff]  ;;  %v85_v1 = vld [vmem:[%s2902_s24 + $0x8] sm:$0xff] }
  0x10   :  { %v1968_v3 = vpack.c.bf16 %v85_v1, %v84_v0  ;;  %v75_v8 = vld [vmem:[%s2903_s28] sm:$0xff] }
  0x11   :  { %v393_v9 = vld [vmem:[%s2904_s0] sm:$0xff] }
  0x12   :  { %1969 = vmatpush3.bf16.msra.mxu0 %v1968_v3 }
  0x13   :  { %1985 = vmatprep.subr.bf16.mxu0 %v2294_v2 }
  0x14   :  { %28 = vsyncpa [#allocation3], 0  ;;  %1860 = vmatmul.mubr.msk.f32.vlgmr.msra.gmra.mrb[0].mxu1 %vm93_vm1, %v393_v9  ;;  %v76_v10 = vld [vmem:[%s2903_s28 + $0x8] sm:$0xff]  ;;  %v77_v12 = vld [vmem:[%s2903_s28 + $0x10] sm:$0xff]  ;;  %s2905_s5 = sld [smem:[#allocation11_spill]]  ;;  %s2298_s1 = smov 64  }
  0x15   :  { %1829 = vmatmul.mubr.msk.f32.vlgmr.msra.gmra.mrb[0].mxu0 %vm93_vm1, %v75_v8  ;;  %1862 = vmatprep.mubr.msk.f32.mxu1 %vm2295_vm0, %v2296_v4  ;;  %v394_v11 = vld [vmem:[%s2904_s0 + $0x8] sm:$0xff]  ;;  %v395_v13 = vld [vmem:[%s2904_s0 + $0x10] sm:$0xff]  ;;  %v78_v14 = vld [vmem:[%s2903_s28 + $0x18] sm:$0xff]  ;;  %s2906_s6 = sld [smem:[#allocation12_spill]]  ;;  %s2907_s9 = sld [smem:[#allocation7_spill]]  ;;  %vm825_vm2 = vcmask 261120  }
  0x16   :  { %1831 = vmatprep.mubr.msk.f32.mxu0 %vm2295_vm0, %v2296_v4  ;;  %v396_v15 = vld [vmem:[%s2904_s0 + $0x18] sm:$0xff]  ;;  %v79_v16 = vld [vmem:[%s2903_s28 + $0x20] sm:$0xff]  ;;  %s2908_s26 = sld [smem:[#allocation8_spill]]  ;;  %s2909_s4 = sld [smem:[#allocation9_spill]]  ;;  %vm1702_vm6 = vcmask 64512  }
  0x17   :  { %v397_v17 = vld [vmem:[%s2904_s0 + $0x20] sm:$0xff] }
  0x18   :  { %1863 = vmatmul.mubr.msk.f32.gmra.mrb[2].mxu1 %vm93_vm1, %v394_v11  ;;  %v1728_v18 = vld [vmem:[%s2874_s10] ss:$0 sm:$0xff]  ;;  %s2297_s10 = smov 96  }
  0x19   :  { %1832 = vmatmul.mubr.msk.f32.gmra.mrb[2].mxu0 %vm93_vm1, %v76_v10  ;;  %1865 = vmatprep.mubr.msk.f32.mxu1 %vm2295_vm0, %v2296_v4 }
  0x1a   :  { %1834 = vmatprep.mubr.msk.f32.mxu0 %vm2295_vm0, %v2296_v4  ;;  %v2507_v24 = vld [vmem:[%s2905_s5] ss:$0 sm:$0xff] }
  0x1c   :  { %1866 = vmatmul.mubr.msk.f32.gmra.mrb[4].mxu1 %vm93_vm1, %v395_v13 }
  0x1d   :  { %1835 = vmatmul.mubr.msk.f32.gmra.mrb[4].mxu0 %vm93_vm1, %v77_v12  ;;  %1868 = vmatprep.mubr.msk.f32.mxu1 %vm2295_vm0, %v2296_v4 }
  0x1e   :  { %1837 = vmatprep.mubr.msk.f32.mxu0 %vm2295_vm0, %v2296_v4 }
  0x20   :  { %1869 = vmatmul.mubr.msk.f32.gmra.mrb[6].mxu1 %vm93_vm1, %v396_v15 }
  0x21   :  { %1838 = vmatmul.mubr.msk.f32.gmra.mrb[6].mxu0 %vm93_vm1, %v78_v14  ;;  %1871 = vmatprep.mubr.msk.f32.mxu1 %vm2295_vm0, %v2296_v4 }
  0x22   :  { %1840 = vmatprep.mubr.msk.f32.mxu0 %vm2295_vm0, %v2296_v4 }
  0x24   :  { %1872 = vmatmul.mubr.msk.f32.gmra.mrb[8].mxu1 %vm93_vm1, %v397_v17 }
  0x25   :  { %1841 = vmatmul.mubr.msk.f32.gmra.mrb[8].mxu0 %vm93_vm1, %v79_v16 }
  0x26   :  { %1843 = vmatprep.mubr.msk.f32.mxu0 %vm2295_vm0, %v2296_v4 }
  0xe7   :  { %v488_v21 = vpop.f32.mrb[0].mxu1 }
  0xe8   :  { %v2500_v19 = vpop.f32.mrb[0].mxu0  ;;  %v2502_v22 = vadd.f32 %v1728_v18, %v488_v21  ;;  %v1861_v23 = vpop.f32.mrb[1].mxu1 }
  0xe9   :  { %v1830_v20 = vpop.f32.mrb[1].mxu0 }
  0xeb   :  { %v493_v28 = vpop.f32.mrb[2].mxu1 }
  0xec   :  { %v192_v25 = vpop.f32.mrb[2].mxu0  ;;  %v1864_v29 = vpop.f32.mrb[3].mxu1  ;;  %v494_v30 = vadd.f32 %v1728_v18, %v493_v28 }
  0xed   :  { %v193_v26 = vadd.f32 %v2507_v24, %v192_v25  ;;  %v1833_v27 = vpop.f32.mrb[3].mxu0 }
  0xee   :  { %v513_v58 = vsub.f32 0.0, %v494_v30 }
  0xef   :  { %2049 = vtanh.f32 %v193_v26  ;;  %v498_v34 = vpop.f32.mrb[4].mxu1  ;;  %v232_v57 = vsub.f32 0.0, %v193_v26 }
  0xf0   :  { %v197_v31 = vpop.f32.mrb[4].mxu0  ;;  %v1867_v35 = vpop.f32.mrb[5].mxu1  ;;  %2051 = vtanh.f32 %v494_v30  ;;  %v499_v36 = vadd.f32 %v1728_v18, %v498_v34  ;;  %v519_v61 = vmul.f32 1.442695, %v513_v58 }
  0xf1   :  { %v198_v32 = vadd.f32 %v2507_v24, %v197_v31  ;;  %v1836_v33 = vpop.f32.mrb[5].mxu0  ;;  %v242_v59 = vmul.f32 1.442695, %v232_v57 }
  0xf2   :  { %v514_v62 = vsub.f32 0.0, %v499_v36 }
  0xf3   :  { %2053 = vtanh.f32 %v198_v32  ;;  %v503_v40 = vpop.f32.mrb[6].mxu1  ;;  %v233_v60 = vsub.f32 0.0, %v198_v32 }
  0xf4   :  { %v202_v37 = vpop.f32.mrb[6].mxu0  ;;  %v1870_v41 = vpop.f32.mrb[7].mxu1  ;;  %2055 = vtanh.f32 %v499_v36  ;;  %v504_v42 = vadd.f32 %v1728_v18, %v503_v40  ;;  %v521_v1 = vmul.f32 1.442695, %v514_v62  ;;  %v607_v62 = vld [vmem:[%s2906_s6 + $0x8] sm:$0xff] }
  0xf5   :  { %v203_v38 = vadd.f32 %v2507_v24, %v202_v37  ;;  %v1839_v39 = vpop.f32.mrb[7].mxu0  ;;  %v244_v63 = vmul.f32 1.442695, %v233_v60 }
  0xf6   :  { %v515_v6 = vsub.f32 0.0, %v504_v42 }
  0xf7   :  { %2057 = vtanh.f32 %v203_v38  ;;  %v508_v44 = vpop.f32.mrb[8].mxu1  ;;  %v234_v0 = vsub.f32 0.0, %v203_v38 }
  0xf8   :  { %v207_v43 = vpop.f32.mrb[8].mxu0  ;;  %v1873_v47 = vpop.f32.mrb[9].mxu1  ;;  %2059 = vtanh.f32 %v504_v42  ;;  %v509_v52 = vadd.f32 %v1728_v18, %v508_v44  ;;  %v523_v8 = vmul.f32 1.442695, %v515_v6  ;;  %v603_v6 = vld [vmem:[%s2907_s9 + $0x8] sm:$0xff] }
  0xf9   :  { %v1842_v45 = vpop.f32.mrb[9].mxu0  ;;  %v208_v46 = vadd.f32 %v2507_v24, %v207_v43  ;;  %v2050_v48 = vpop.eup %2049  ;;  %v246_v5 = vmul.f32 1.442695, %v234_v0 }
  0xfa   :  { %305 = vrot.lane.b32.xlu0 %v2050_v48, %s2297_s10  ;;  %v2052_v49 = vpop.eup %2051  ;;  %v516_v11 = vsub.f32 0.0, %v509_v52 }
  0xfb   :  { %2061 = vtanh.f32 %v208_v46  ;;  %v235_v3 = vsub.f32 0.0, %v208_v46 }
  0xfc   :  { %2063 = vtanh.f32 %v509_v52  ;;  %v525_v15 = vmul.f32 1.442695, %v516_v11  ;;  %v805_v11 = vld [vmem:[%s2875_s11 + $0x18] sm:$0xff] }
  0xfd   :  { %v2054_v50 = vpop.eup %2053  ;;  %2065 = vpow2.f32 %v242_v59  ;;  %v248_v7 = vmul.f32 1.442695, %v235_v3  ;;  %v803_v3 = vld [vmem:[%s2875_s11 + $0x8] sm:$0xff] }
  0xfe   :  { %554 = vrot.lane.b32.xlu0 %v2052_v49, %s2297_s10  ;;  %307 = vrot.lane.b32.xlu1 %v2054_v50, %s2297_s10  ;;  %v2056_v51 = vpop.eup %2055  ;;  %2067 = vpow2.f32 %v519_v61  ;;  %v606_v61 = vld [vmem:[%s2906_s6] sm:$0xff] }
  0xff   :  { %2069 = vpow2.f32 %v244_v63  ;;  %v602_v63 = vld [vmem:[%s2907_s9] sm:$0xff]  ;;  %v1973_v0 = vpack.c.bf16 %v607_v62, %v606_v61 }
 0x100   :  { %2071 = vpow2.f32 %v521_v1  ;;  %1878 = vmatprep.mubr.msk.f32.mxu1 %vm93_vm1, %v602_v63  ;;  %v802_v1 = vld [vmem:[%s2875_s11] sm:$0xff] }
 0x101   :  { %v2058_v53 = vpop.eup %2057  ;;  %2073 = vpow2.f32 %v246_v5  ;;  %v1977_v5 = vpack.c.bf16 %v803_v3, %v802_v1  ;;  %1974 = vmatprep.subr.bf16.mxu1 %v1973_v0  ;;  %v1734_v3 = vld [vmem:[%s2872_s8] ss:$0 sm:$0xff] }
 0x102   :  { %556 = vrot.lane.b32.xlu1 %v2056_v51, %s2297_s10  ;;  %309 = vrot.lane.b32.xlu0 %v2058_v53, %s2297_s10  ;;  %v2060_v54 = vpop.eup %2059  ;;  %2075 = vpow2.f32 %v248_v7  ;;  %v604_v7 = vld [vmem:[%s2907_s9 + $0x10] sm:$0xff] }
 0x103   :  { %2077 = vpow2.f32 %v523_v8  ;;  %1976 = vmatpush3.bf16.msra.mxu1 %v1973_v0 }
 0x104   :  { %1978 = vmatprep.subr.bf16.mxu1 %v1977_v5 }
 0x105   :  { %v2062_v55 = vpop.eup %2061 }
 0x106   :  { %558 = vrot.lane.b32.xlu1 %v2060_v54, %s2297_s10  ;;  %311 = vrot.lane.b32.xlu0 %v2062_v55, %s2297_s10  ;;  %v2064_v56 = vpop.eup %2063 }
 0x107   :  { %v2066_v9 = vpop.eup %2065  ;;  %1879 = vmatmul.mubr.msk.f32.vlgmr.msra.gmra.mrb[10].mxu1 %vm93_vm1, %v603_v6 }
 0x108   :  { %v2068_v10 = vpop.eup %2067  ;;  %v259_v12 = vadd.f32 1.0, %v2066_v9  ;;  %1980 = vmatpush3.bf16.msra.mxu1 %v1977_v5  ;;  %1881 = vmatprep.mubr.msk.f32.mxu1 %vm93_vm1, %v604_v7  ;;  %v605_v9 = vld [vmem:[%s2907_s9 + $0x18] sm:$0xff] }
 0x109   :  { %v2070_v13 = vpop.eup %2069  ;;  %v528_v14 = vadd.f32 1.0, %v2068_v10  ;;  %v804_v10 = vld [vmem:[%s2875_s11 + $0x10] sm:$0xff] }
 0x10a   :  { %560 = vrot.lane.b32.xlu1 %v2064_v56, %s2297_s10  ;;  %v2072_v16 = vpop.eup %2071  ;;  %2079 = vrcp.f32 %v259_v12  ;;  %v260_v17 = vadd.f32 1.0, %v2070_v13  ;;  %v1981_v12 = vpack.c.bf16 %v805_v11, %v804_v10 }
 0x10b   :  { %v2074_v18 = vpop.eup %2073  ;;  %2081 = vrcp.f32 %v528_v14  ;;  %v529_v20 = vadd.f32 1.0, %v2072_v16  ;;  %1882 = vmatmul.mubr.msk.f32.gmra.mrb[12].mxu1 %vm93_vm1, %v605_v9 }
 0x10c   :  { %2083 = vpow2.f32 %v525_v15  ;;  %v2076_v21 = vpop.eup %2075  ;;  %v261_v23 = vadd.f32 1.0, %v2074_v18  ;;  %1982 = vmatprep.subr.bf16.mxu1 %v1981_v12 }
 0x10d   :  { %2085 = vrcp.f32 %v260_v17  ;;  %v2078_v25 = vpop.eup %2077  ;;  %v262_v26 = vadd.f32 1.0, %v2076_v21  ;;  %1984 = vmatpush3.bf16.msra.mxu1 %v1981_v12 }
 0x10e   :  { %2087 = vrcp.f32 %v529_v20  ;;  %v530_v27 = vadd.f32 1.0, %v2078_v25  ;;  %1991 = vmatprep.subr.bf16.mxu1 %v2294_v2 }
 0x10f   :  { %2089 = vrcp.f32 %v261_v23 }
 0x110   :  { %2091 = vrcp.f32 %v262_v26 }
 0x111   :  { %2093 = vrcp.f32 %v530_v27 }
 0x114   :  { %v2521_v28 = vpop.eup %2079 }
 0x115   :  { %v2524_v31 = vpop.eup %2081 }
 0x116   :  { %v2084_v32 = vpop.eup %2083 }
 0x117   :  { %v2526_v33 = vpop.eup %2085  ;;  %v531_v38 = vadd.f32 1.0, %v2084_v32 }
 0x118   :  { %v2530_v39 = vpop.eup %2087 }
 0x119   :  { %v2532_v40 = vpop.eup %2089 }
 0x11a   :  { %v2536_v45 = vpop.eup %2091 }
 0x11b   :  { %v2538_v46 = vpop.eup %2093 }
 0x16c   :  { %v306_v29 = vpop.permute.xlu0 %305 }
 0x16d   :  { %v331_v30 = vmul.f32 %v2521_v28, %v306_v29 }
 0x16f   :  { %2095 = vtanh.f32 %v331_v30 }
 0x170   :  { %v555_v34 = vpop.permute.xlu0 %554  ;;  %v308_v35 = vpop.permute.xlu1 %307 }
 0x171   :  { %v568_v36 = vmul.f32 %v2524_v31, %v555_v34  ;;  %v332_v37 = vmul.f32 %v2526_v33, %v308_v35  ;;  %v81_v35 = vld [vmem:[%s2903_s28 + $0x30] sm:$0xff] }
 0x173   :  { %2097 = vtanh.f32 %v568_v36 }
 0x174   :  { %2099 = vtanh.f32 %v332_v37  ;;  %v557_v41 = vpop.permute.xlu1 %556  ;;  %v310_v42 = vpop.permute.xlu0 %309 }
 0x175   :  { %v569_v43 = vmul.f32 %v2530_v39, %v557_v41  ;;  %v333_v44 = vmul.f32 %v2532_v40, %v310_v42  ;;  %2101 = vrcp.f32 %v531_v38  ;;  %v82_v38 = vld [vmem:[%s2903_s28 + $0x38] sm:$0xff]  ;;  %v83_v42 = vld [vmem:[%s2903_s28 + $0x40] sm:$0xff] }
 0x177   :  { %2103 = vtanh.f32 %v569_v43 }
 0x178   :  { %2105 = vtanh.f32 %v333_v44  ;;  %v559_v47 = vpop.permute.xlu1 %558  ;;  %v312_v50 = vpop.permute.xlu0 %311 }
 0x179   :  { %v2096_v48 = vpop.eup %2095  ;;  %v570_v49 = vmul.f32 %v2538_v46, %v559_v47  ;;  %v334_v51 = vmul.f32 %v2536_v45, %v312_v50 }
 0x17a   :  { %359 = vrot.lane.b32.xlu0 %v2096_v48, %s2298_s1 }
 0x17b   :  { %2107 = vtanh.f32 %v570_v49 }
 0x17c   :  { %2109 = vtanh.f32 %v334_v51  ;;  %v561_v56 = vpop.permute.xlu1 %560 }
 0x17d   :  { %v2098_v52 = vpop.eup %2097 }
 0x17e   :  { %v2100_v53 = vpop.eup %2099  ;;  %584 = vrot.lane.b32.xlu1 %v2098_v52, %s2298_s1 }
 0x17f   :  { %361 = vrot.lane.b32.xlu0 %v2100_v53, %s2298_s1  ;;  %v2545_v54 = vpop.eup %2101 }
 0x180   :  { %v571_v58 = vmul.f32 %v2545_v54, %v561_v56 }
 0x181   :  { %v2104_v55 = vpop.eup %2103 }
 0x182   :  { %v2106_v57 = vpop.eup %2105  ;;  %586 = vrot.lane.b32.xlu1 %v2104_v55, %s2298_s1  ;;  %2111 = vtanh.f32 %v571_v58 }
 0x183   :  { %363 = vrot.lane.b32.xlu0 %v2106_v57, %s2298_s1 }
 0x185   :  { %v2108_v59 = vpop.eup %2107 }
 0x186   :  { %v2110_v60 = vpop.eup %2109  ;;  %588 = vrot.lane.b32.xlu1 %v2108_v59, %s2298_s1 }
 0x187   :  { %365 = vrot.lane.b32.xlu0 %v2110_v60, %s2298_s1  ;;  %v1739_v60 = vld [vmem:[%s2876_s12] ss:$0 sm:$0xff] }
 0x18c   :  { %v2112_v8 = vpop.eup %2111 }
 0x18d   :  { %590 = vrot.lane.b32.xlu1 %v2112_v8, %s2298_s1 }
 0x1da   :  { %v1880_v44 = vpop.f32.mrb[10].mxu1 }
 0x1ec   :  { %v360_v13 = vpop.permute.xlu0 %359 }
 0x1ed   :  { %v385_v15 = vmul.f32 %v2521_v28, %v360_v13  ;;  %v699_v13 = vadd.f32 %v1880_v44, %v1734_v3 }
 0x1ef   :  { %v713_v44 = vsub.f32 0.0, %v699_v13 }
 0x1f0   :  { %v585_v14 = vpop.permute.xlu1 %584 }
 0x1f1   :  { %v598_v16 = vmul.f32 %v2524_v31, %v585_v14  ;;  %v362_v17 = vpop.permute.xlu0 %361  ;;  %v80_v31 = vld [vmem:[%s2903_s28 + $0x28] sm:$0xff] }
 0x1f2   :  { %v386_v23 = vmul.f32 %v2526_v33, %v362_v17  ;;  %1844 = vmatmul.mubr.msk.f32.gmra.mrb[10].mxu0 %vm93_vm1, %v80_v31 }
 0x1f3   :  { %v786_v18 = vadd.f32 %v598_v16, %v385_v15  ;;  %1846 = vmatprep.mubr.msk.f32.mxu0 %vm2295_vm0, %v2296_v4 }
 0x1f4   :  { %v587_v20 = vpop.permute.xlu1 %586 }
 0x1f5   :  { %v790_v21 = vmul.f32 0.5, %v786_v18  ;;  %v599_v25 = vmul.f32 %v2530_v39, %v587_v20  ;;  %v364_v26 = vpop.permute.xlu0 %363 }
 0x1f6   :  { %v387_v32 = vmul.f32 %v2532_v40, %v364_v26  ;;  %1847 = vmatmul.mubr.msk.f32.gmra.mrb[12].mxu0 %vm93_vm1, %v81_v35 }
 0x1f7   :  { %v787_v27 = vadd.f32 %v599_v25, %v386_v23  ;;  %817 = vrot.lane.b32.xlu0 %v790_v21, %s2298_s1  ;;  %1849 = vmatprep.mubr.msk.f32.mxu0 %vm2295_vm0, %v2296_v4 }
 0x1f8   :  { %v589_v29 = vpop.permute.xlu1 %588 }
 0x1f9   :  { %v791_v30 = vmul.f32 0.5, %v787_v27  ;;  %v600_v28 = vmul.f32 %v2538_v46, %v589_v29  ;;  %v366_v36 = vpop.permute.xlu0 %365 }
 0x1fa   :  { %v388_v39 = vmul.f32 %v2536_v45, %v366_v36  ;;  %1850 = vmatmul.mubr.msk.f32.gmra.mrb[14].mxu0 %vm93_vm1, %v82_v38  ;;  %v693_v45 = vpop.f32.mrb[11].mxu1 }
 0x1fb   :  { %v788_v34 = vadd.f32 %v600_v28, %v387_v32  ;;  %819 = vrot.lane.b32.xlu1 %v791_v30, %s2298_s1  ;;  %1852 = vmatprep.mubr.msk.f32.mxu0 %vm2295_vm0, %v2296_v4  ;;  %v1883_v46 = vpop.f32.mrb[12].mxu1  ;;  %v694_v11 = vadd.f32 %v1734_v3, %v693_v45 }
 0x1fc   :  { %v703_v47 = vpop.f32.mrb[13].mxu1  ;;  %v709_v20 = vadd.f32 %v1883_v46, %v1734_v3 }
 0x1fd   :  { %v792_v33 = vmul.f32 0.5, %v788_v34  ;;  %v704_v15 = vadd.f32 %v1734_v3, %v703_v47  ;;  %v712_v36 = vsub.f32 0.0, %v694_v11 }
 0x1fe   :  { %1853 = vmatmul.mubr.msk.f32.gmra.mrb[16].mxu0 %vm93_vm1, %v83_v42 }
 0x1ff   :  { %821 = vrot.lane.b32.xlu0 %v792_v33, %s2298_s1  ;;  %v591_v37 = vpop.permute.xlu1 %590  ;;  %1906 = vmatprep.mubr.msk.f32.mxu0 %vm2295_vm0, %v2296_v4  ;;  %v716_v42 = vmul.f32 1.442695, %v712_v36 }
 0x200   :  { %v601_v40 = vmul.f32 %v2545_v54, %v591_v37 }
 0x202   :  { %v789_v41 = vadd.f32 %v601_v40, %v388_v39 }
 0x204   :  { %v793_v43 = vmul.f32 0.5, %v789_v41 }
 0x206   :  { %823 = vrot.lane.b32.xlu1 %v793_v43, %s2298_s1 }
 0x269   :  { %v818_v48 = vpop.permute.xlu0 %817 }
 0x26a   :  { %1892 = vmatprep.mubr.msk.f32.mxu1 %vm825_vm2, %v818_v48  ;;  %v714_v48 = vsub.f32 0.0, %v704_v15 }
 0x26d   :  { %v820_v49 = vpop.permute.xlu1 %819 }
 0x26e   :  { %1893 = vmatmul.mubr.msk.f32.vlgmr.msra.gmra.mrb[14].mxu1 %vm825_vm2, %v820_v49  ;;  %v718_v49 = vmul.f32 1.442695, %v713_v44 }
 0x271   :  { %v822_v50 = vpop.permute.xlu0 %821 }
 0x272   :  { %1895 = vmatprep.mubr.msk.f32.mxu1 %vm825_vm2, %v822_v50 }
 0x278   :  { %v824_v51 = vpop.permute.xlu1 %823 }
 0x279   :  { %1896 = vmatmul.mubr.msk.f32.gmra.mrb[16].mxu1 %vm825_vm2, %v824_v51  ;;  %v715_v51 = vsub.f32 0.0, %v709_v20 }
 0x27a   :  { %1917 = vmatprep.mubr.msk.f32.mxu1 %vm2295_vm0, %v2296_v4 }
 0x2c5   :  { %v212_v52 = vpop.f32.mrb[10].mxu0 }
 0x2c6   :  { %v1845_v53 = vpop.f32.mrb[11].mxu0  ;;  %v213_v10 = vadd.f32 %v2507_v24, %v212_v52 }
 0x2c8   :  { %v236_v39 = vsub.f32 0.0, %v213_v10 }
 0x2c9   :  { %v217_v54 = vpop.f32.mrb[12].mxu0 }
 0x2ca   :  { %v1848_v55 = vpop.f32.mrb[13].mxu0  ;;  %v2640_v12 = vadd.f32 %v2507_v24, %v217_v54  ;;  %v250_v43 = vmul.f32 1.442695, %v236_v39  ;;  %v720_v54 = vmul.f32 1.442695, %v714_v48 }
 0x2cc   :  { %v237_v47 = vsub.f32 0.0, %v2640_v12 }
 0x2cd   :  { %v222_v56 = vpop.f32.mrb[14].mxu0 }
 0x2ce   :  { %v1851_v57 = vpop.f32.mrb[15].mxu0  ;;  %v2644_v14 = vadd.f32 %v2507_v24, %v222_v56  ;;  %v252_v52 = vmul.f32 1.442695, %v237_v47 }
 0x2d0   :  { %v238_v50 = vsub.f32 0.0, %v2644_v14 }
 0x2d1   :  { %v227_v58 = vpop.f32.mrb[16].mxu0 }
 0x2d2   :  { %v1854_v59 = vpop.f32.mrb[17].mxu0  ;;  %v228_v18 = vadd.f32 %v2507_v24, %v227_v58  ;;  %v254_v56 = vmul.f32 1.442695, %v238_v50  ;;  %v722_v58 = vmul.f32 1.442695, %v715_v51 }
 0x2d4   :  { %v239_v53 = vsub.f32 0.0, %v228_v18 }
 0x2d6   :  { %v256_v59 = vmul.f32 1.442695, %v239_v53 }
 0x341   :  { %v1894_v61 = vpop.f32.mrb[14].mxu1 }
 0x342   :  { %v906_v62 = vadd.f32 %v1894_v61, %v1739_v60  ;;  %v900_v63 = vpop.f32.mrb[15].mxu1 }
 0x343   :  { %v901_v0 = vadd.f32 %v1739_v60, %v900_v63 }
 0x344   :  { %2113 = vtanh.f32 %v906_v62  ;;  %v920_v32 = vsub.f32 0.0, %v906_v62 }
 0x345   :  { %2115 = vtanh.f32 %v901_v0  ;;  %v919_v28 = vsub.f32 0.0, %v901_v0 }
 0x346   :  { %v925_v34 = vmul.f32 1.442695, %v920_v32 }
 0x347   :  { %v923_v31 = vmul.f32 1.442695, %v919_v28 }
 0x34c   :  { %v1897_v5 = vpop.f32.mrb[16].mxu1 }
 0x34d   :  { %v916_v7 = vadd.f32 %v1897_v5, %v1739_v60  ;;  %v910_v8 = vpop.f32.mrb[17].mxu1 }
 0x34e   :  { %v2114_v1 = vpop.eup %2113  ;;  %v911_v9 = vadd.f32 %v1739_v60, %v910_v8 }
 0x34f   :  { %v2116_v6 = vpop.eup %2115  ;;  %953 = vrot.lane.b32.xlu1 %v2114_v1, %s2297_s10  ;;  %2117 = vtanh.f32 %v916_v7  ;;  %v922_v33 = vsub.f32 0.0, %v916_v7 }
 0x350   :  { %951 = vrot.lane.b32.xlu0 %v2116_v6, %s2297_s10  ;;  %2119 = vtanh.f32 %v911_v9  ;;  %v921_v35 = vsub.f32 0.0, %v911_v9 }
 0x351   :  { %2121 = vtanh.f32 %v213_v10  ;;  %v929_v37 = vmul.f32 1.442695, %v922_v33 }
 0x352   :  { %2123 = vtanh.f32 %v694_v11  ;;  %v927_v38 = vmul.f32 1.442695, %v921_v35 }
 0x353   :  { %2125 = vtanh.f32 %v2640_v12 }
 0x354   :  { %2127 = vtanh.f32 %v699_v13 }
 0x355   :  { %2129 = vtanh.f32 %v2644_v14 }
 0x356   :  { %2131 = vtanh.f32 %v704_v15 }
 0x357   :  { %2133 = vtanh.f32 %v228_v18 }
 0x358   :  { %2135 = vtanh.f32 %v709_v20 }
 0x359   :  { %v2118_v16 = vpop.eup %2117  ;;  %2137 = vpow2.f32 %v925_v34 }
 0x35a   :  { %v2120_v17 = vpop.eup %2119  ;;  %957 = vrot.lane.b32.xlu1 %v2118_v16, %s2297_s10  ;;  %2139 = vpow2.f32 %v923_v31 }
 0x35b   :  { %955 = vrot.lane.b32.xlu0 %v2120_v17, %s2297_s10  ;;  %v2122_v21 = vpop.eup %2121  ;;  %2141 = vpow2.f32 %v929_v37 }
 0x35c   :  { %v2124_v23 = vpop.eup %2123  ;;  %2143 = vpow2.f32 %v927_v38 }
 0x35d   :  { %v2126_v25 = vpop.eup %2125  ;;  %2145 = vpow2.f32 %v716_v42 }
 0x35e   :  { %744 = vrot.lane.b32.xlu1 %v2124_v23, %s2297_s10  ;;  %v2128_v26 = vpop.eup %2127  ;;  %2147 = vpow2.f32 %v250_v43 }
 0x35f   :  { %313 = vrot.lane.b32.xlu0 %v2122_v21, %s2297_s10  ;;  %v2130_v27 = vpop.eup %2129 }
 0x360   :  { %v2132_v24 = vpop.eup %2131 }
 0x361   :  { %v2134_v29 = vpop.eup %2133 }
 0x362   :  { %746 = vrot.lane.b32.xlu1 %v2128_v26, %s2297_s10  ;;  %v2136_v30 = vpop.eup %2135 }
 0x363   :  { %315 = vrot.lane.b32.xlu0 %v2126_v25, %s2297_s10  ;;  %v2138_v40 = vpop.eup %2137 }
 0x364   :  { %v2140_v41 = vpop.eup %2139  ;;  %v932_v45 = vadd.f32 1.0, %v2138_v40 }
 0x365   :  { %v931_v46 = vadd.f32 1.0, %v2140_v41  ;;  %v2142_v55 = vpop.eup %2141 }
 0x366   :  { %748 = vrot.lane.b32.xlu1 %v2132_v24, %s2297_s10  ;;  %2149 = vrcp.f32 %v932_v45  ;;  %v2144_v57 = vpop.eup %2143  ;;  %v934_v60 = vadd.f32 1.0, %v2142_v55 }
 0x367   :  { %317 = vrot.lane.b32.xlu0 %v2130_v27, %s2297_s10  ;;  %2151 = vrcp.f32 %v931_v46  ;;  %v2146_v61 = vpop.eup %2145  ;;  %v933_v62 = vadd.f32 1.0, %v2144_v57 }
 0x368   :  { %2153 = vpow2.f32 %v718_v49  ;;  %v2148_v63 = vpop.eup %2147  ;;  %v724_v8 = vadd.f32 1.0, %v2146_v61 }
 0x369   :  { %2155 = vpow2.f32 %v252_v52  ;;  %v263_v10 = vadd.f32 1.0, %v2148_v63 }
 0x36a   :  { %750 = vrot.lane.b32.xlu1 %v2136_v30, %s2297_s10  ;;  %2157 = vpow2.f32 %v720_v54 }
 0x36b   :  { %319 = vrot.lane.b32.xlu0 %v2134_v29, %s2297_s10  ;;  %2159 = vpow2.f32 %v254_v56 }
 0x36c   :  { %2161 = vpow2.f32 %v722_v58 }
 0x36d   :  { %2163 = vpow2.f32 %v256_v59 }
 0x36e   :  { %2165 = vrcp.f32 %v934_v60 }
 0x36f   :  { %2167 = vrcp.f32 %v933_v62 }
 0x370   :  { %v2660_v0 = vpop.eup %2149 }
 0x371   :  { %v2662_v3 = vpop.eup %2151 }
 0x372   :  { %v2154_v9 = vpop.eup %2153 }
 0x373   :  { %v2156_v11 = vpop.eup %2155  ;;  %v725_v13 = vadd.f32 1.0, %v2154_v9 }
 0x374   :  { %v2158_v12 = vpop.eup %2157  ;;  %v264_v15 = vadd.f32 1.0, %v2156_v11 }
 0x375   :  { %v2160_v14 = vpop.eup %2159  ;;  %v726_v18 = vadd.f32 1.0, %v2158_v12 }
 0x376   :  { %v2162_v16 = vpop.eup %2161  ;;  %v265_v21 = vadd.f32 1.0, %v2160_v14 }
 0x377   :  { %v2164_v17 = vpop.eup %2163  ;;  %v727_v24 = vadd.f32 1.0, %v2162_v16 }
 0x378   :  { %v2666_v20 = vpop.eup %2165  ;;  %v266_v32 = vadd.f32 1.0, %v2164_v17 }
 0x379   :  { %v2668_v23 = vpop.eup %2167 }
 0x3c1   :  { %v954_v1 = vpop.permute.xlu1 %953 }
 0x3c2   :  { %v964_v5 = vmul.f32 %v2660_v0, %v954_v1  ;;  %v952_v6 = vpop.permute.xlu0 %951 }
 0x3c3   :  { %v963_v7 = vmul.f32 %v2662_v3, %v952_v6 }
 0x3c4   :  { %2169 = vtanh.f32 %v964_v5 }
 0x3c5   :  { %2171 = vtanh.f32 %v963_v7 }
 0x3c6   :  { %2173 = vrcp.f32 %v724_v8 }
 0x3c7   :  { %2175 = vrcp.f32 %v263_v10 }
 0x3c8   :  { %2177 = vrcp.f32 %v725_v13 }
 0x3c9   :  { %2179 = vrcp.f32 %v264_v15 }
 0x3ca   :  { %2181 = vrcp.f32 %v726_v18 }
 0x3cb   :  { %2183 = vrcp.f32 %v265_v21 }
 0x3cc   :  { %v958_v26 = vpop.permute.xlu1 %957 }
 0x3cd   :  { %v966_v29 = vmul.f32 %v2666_v20, %v958_v26  ;;  %v956_v30 = vpop.permute.xlu0 %955 }
 0x3ce   :  { %v2170_v25 = vpop.eup %2169  ;;  %v965_v28 = vmul.f32 %v2668_v23, %v956_v30 }
 0x3cf   :  { %v2172_v27 = vpop.eup %2171  ;;  %977 = vrot.lane.b32.xlu1 %v2170_v25, %s2298_s1  ;;  %2185 = vtanh.f32 %v966_v29 }
 0x3d0   :  { %975 = vrot.lane.b32.xlu0 %v2172_v27, %s2298_s1  ;;  %v2674_v34 = vpop.eup %2173  ;;  %2187 = vtanh.f32 %v965_v28  ;;  %v745_v31 = vpop.permute.xlu1 %744 }
 0x3d1   :  { %v2676_v33 = vpop.eup %2175  ;;  %2189 = vrcp.f32 %v727_v24  ;;  %v756_v35 = vmul.f32 %v2674_v34, %v745_v31  ;;  %v314_v36 = vpop.permute.xlu0 %313 }
 0x3d2   :  { %2191 = vrcp.f32 %v266_v32  ;;  %v335_v37 = vmul.f32 %v2676_v33, %v314_v36  ;;  %v2680_v38 = vpop.eup %2177 }
 0x3d3   :  { %2193 = vtanh.f32 %v756_v35  ;;  %v2682_v40 = vpop.eup %2179 }
 0x3d4   :  { %2195 = vtanh.f32 %v335_v37  ;;  %v747_v39 = vpop.permute.xlu1 %746  ;;  %v2686_v44 = vpop.eup %2181 }
 0x3d5   :  { %v757_v41 = vmul.f32 %v2680_v38, %v747_v39  ;;  %v316_v42 = vpop.permute.xlu0 %315  ;;  %v2688_v45 = vpop.eup %2183 }
 0x3d6   :  { %v336_v43 = vmul.f32 %v2682_v40, %v316_v42 }
 0x3d7   :  { %2197 = vtanh.f32 %v757_v41 }
 0x3d8   :  { %2199 = vtanh.f32 %v336_v43  ;;  %v749_v46 = vpop.permute.xlu1 %748 }
 0x3d9   :  { %v2186_v47 = vpop.eup %2185  ;;  %v758_v48 = vmul.f32 %v2686_v44, %v749_v46  ;;  %v318_v49 = vpop.permute.xlu0 %317 }
 0x3da   :  { %v2188_v50 = vpop.eup %2187  ;;  %v337_v51 = vmul.f32 %v2688_v45, %v318_v49  ;;  %981 = vrot.lane.b32.xlu1 %v2186_v47, %s2298_s1 }
 0x3db   :  { %v2190_v52 = vpop.eup %2189  ;;  %2201 = vtanh.f32 %v758_v48  ;;  %979 = vrot.lane.b32.xlu0 %v2188_v50, %s2298_s1 }
 0x3dc   :  { %v2192_v53 = vpop.eup %2191  ;;  %2203 = vtanh.f32 %v337_v51  ;;  %v751_v54 = vpop.permute.xlu1 %750  ;;  %v1167_v51 = vld [vmem:[%s2879_s15 + $0x10] sm:$0xff] }
 0x3dd   :  { %v2194_v55 = vpop.eup %2193  ;;  %v759_v56 = vmul.f32 %v2190_v52, %v751_v54  ;;  %v320_v57 = vpop.permute.xlu0 %319 }
 0x3de   :  { %v2196_v58 = vpop.eup %2195  ;;  %v338_v59 = vmul.f32 %v2192_v53, %v320_v57  ;;  %768 = vrot.lane.b32.xlu1 %v2194_v55, %s2298_s1 }
 0x3df   :  { %2205 = vtanh.f32 %v759_v56  ;;  %367 = vrot.lane.b32.xlu0 %v2196_v58, %s2298_s1 }
 0x3e0   :  { %2207 = vtanh.f32 %v338_v59  ;;  %v1081_v59 = vld [vmem:[%s2877_s13] sm:$0xff] }
 0x3e1   :  { %v2198_v60 = vpop.eup %2197 }
 0x3e2   :  { %v2200_v61 = vpop.eup %2199  ;;  %770 = vrot.lane.b32.xlu1 %v2198_v60, %s2298_s1  ;;  %v1082_v60 = vld [vmem:[%s2877_s13 + $0x8] sm:$0xff] }
 0x3e3   :  { %369 = vrot.lane.b32.xlu0 %v2200_v61, %s2298_s1  ;;  %v1992_v61 = vpack.c.bf16 %v1082_v60, %v1081_v59 }
 0x3e5   :  { %v2202_v62 = vpop.eup %2201  ;;  %1993 = vmatpush3.bf16.msra.mxu1 %v1992_v61 }
 0x3e6   :  { %v2204_v63 = vpop.eup %2203  ;;  %772 = vrot.lane.b32.xlu1 %v2202_v62, %s2298_s1  ;;  %1994 = vmatprep.subr.bf16.mxu1 %v2294_v2  ;;  %v1083_v62 = vld [vmem:[%s2877_s13 + $0x10] sm:$0xff] }
 0x3e7   :  { %371 = vrot.lane.b32.xlu0 %v2204_v63, %s2298_s1  ;;  %v1084_v63 = vld [vmem:[%s2877_s13 + $0x18] sm:$0xff] }
 0x3e9   :  { %v2206_v1 = vpop.eup %2205 }
 0x3ea   :  { %v2208_v5 = vpop.eup %2207  ;;  %774 = vrot.lane.b32.xlu1 %v2206_v1, %s2298_s1  ;;  %v1995_v1 = vpack.c.bf16 %v1084_v63, %v1083_v62 }
 0x3eb   :  { %373 = vrot.lane.b32.xlu0 %v2208_v5, %s2298_s1 }
 0x3ec   :  { %1996 = vmatpush3.bf16.msra.mxu1 %v1995_v1 }
 0x3ed   :  { %2005 = vmatprep.subr.bf16.mxu1 %v2294_v2 }
 0x441   :  { %v978_v6 = vpop.permute.xlu1 %977 }
 0x442   :  { %v988_v7 = vmul.f32 %v2660_v0, %v978_v6  ;;  %v976_v8 = vpop.permute.xlu0 %975 }
 0x443   :  { %v987_v9 = vmul.f32 %v2662_v3, %v976_v8 }
 0x445   :  { %v2029_v10 = vpack.i.bf16 %v988_v7, %v987_v9  ;;  %v1747_v7 = vld [vmem:[%s2880_s16] ss:$0 sm:$0xff] }
 0x447   :  { %2030 = vrot.lane.b32.xlu0 %v2029_v10, %s2298_s1 }
 0x44c   :  { %v982_v11 = vpop.permute.xlu1 %981 }
 0x44d   :  { %v990_v12 = vmul.f32 %v2666_v20, %v982_v11  ;;  %v980_v13 = vpop.permute.xlu0 %979 }
 0x44e   :  { %v989_v14 = vmul.f32 %v2668_v23, %v980_v13 }
 0x450   :  { %v2034_v15 = vpack.i.bf16 %v990_v12, %v989_v14  ;;  %v769_v16 = vpop.permute.xlu1 %768 }
 0x451   :  { %v780_v17 = vmul.f32 %v2674_v34, %v769_v16  ;;  %v368_v18 = vpop.permute.xlu0 %367 }
 0x452   :  { %v389_v21 = vmul.f32 %v2676_v33, %v368_v18  ;;  %2035 = vrot.lane.b32.xlu1 %v2034_v15, %s2298_s1 }
 0x454   :  { %v794_v0 = vadd.f32 %v780_v17, %v389_v21  ;;  %v771_v3 = vpop.permute.xlu1 %770 }
 0x455   :  { %v781_v25 = vmul.f32 %v2680_v38, %v771_v3  ;;  %v370_v26 = vpop.permute.xlu0 %369 }
 0x456   :  { %v798_v27 = vmul.f32 0.5, %v794_v0  ;;  %v390_v20 = vmul.f32 %v2682_v40, %v370_v26 }
 0x458   :  { %v795_v24 = vadd.f32 %v781_v25, %v390_v20  ;;  %v773_v29 = vpop.permute.xlu1 %772  ;;  %1180 = vrot.lane.b32.xlu0 %v798_v27, %s2298_s1 }
 0x459   :  { %v782_v23 = vmul.f32 %v2686_v44, %v773_v29  ;;  %v372_v30 = vpop.permute.xlu0 %371  ;;  %v1165_v44 = vld [vmem:[%s2879_s15] sm:$0xff] }
 0x45a   :  { %v799_v32 = vmul.f32 0.5, %v795_v24  ;;  %v391_v28 = vmul.f32 %v2688_v45, %v372_v30  ;;  %v1166_v45 = vld [vmem:[%s2879_s15 + $0x8] sm:$0xff] }
 0x45b   :  { %v1997_v49 = vpack.c.bf16 %v1166_v45, %v1165_v44 }
 0x45c   :  { %v796_v34 = vadd.f32 %v782_v23, %v391_v28  ;;  %v775_v31 = vpop.permute.xlu1 %774  ;;  %1182 = vrot.lane.b32.xlu1 %v799_v32, %s2298_s1 }
 0x45d   :  { %v783_v33 = vmul.f32 %v2190_v52, %v775_v31  ;;  %v374_v35 = vpop.permute.xlu0 %373  ;;  %v1168_v52 = vld [vmem:[%s2879_s15 + $0x18] sm:$0xff] }
 0x45e   :  { %v800_v36 = vmul.f32 0.5, %v796_v34  ;;  %v392_v37 = vmul.f32 %v2192_v53, %v374_v35  ;;  %v991_v53 = vld [vmem:[%s2908_s26] sm:$0xff]  ;;  %v2001_v54 = vpack.c.bf16 %v1168_v52, %v1167_v51 }
 0x460   :  { %v797_v38 = vadd.f32 %v783_v33, %v392_v37  ;;  %1184 = vrot.lane.b32.xlu0 %v800_v36, %s2298_s1 }
 0x462   :  { %v801_v39 = vmul.f32 0.5, %v797_v38 }
 0x464   :  { %1186 = vrot.lane.b32.xlu1 %v801_v39, %s2298_s1 }
 0x4b9   :  { %v2031_v40 = vpop.permute.xlu0 %2030 }
 0x4ba   :  { %v2033_v41 = vunpack.i.h.bf16 %v2031_v40  ;;  %v2032_v42 = vunpack.i.l.bf16 %v2031_v40 }
 0x4bc   :  { %v1986_v43 = vpack.c.bf16 %v2033_v41, %v2032_v42 }
 0x4be   :  { %1987 = vmatpush3.bf16.msra.mxu0 %v1986_v43 }
 0x4bf   :  { %1988 = vmatprep.subr.bf16.mxu0 %v2294_v2 }
 0x4c4   :  { %v2036_v46 = vpop.permute.xlu1 %2035 }
 0x4c5   :  { %v2038_v47 = vunpack.i.h.bf16 %v2036_v46  ;;  %v2037_v48 = vunpack.i.l.bf16 %v2036_v46 }
 0x4c7   :  { %v1989_v50 = vpack.c.bf16 %v2038_v47, %v2037_v48 }
 0x4c9   :  { %1990 = vmatpush3.bf16.msra.mxu0 %v1989_v50 }
 0x4ca   :  { %1998 = vmatprep.subr.bf16.mxu0 %v1997_v49  ;;  %v1181_v55 = vpop.permute.xlu0 %1180 }
 0x4cc   :  { %1907 = vmatmul.mubr.msk.f32.vlgmr.msra.gmra.mrb[18].mxu0 %vm825_vm2, %v991_v53 }
 0x4cd   :  { %2000 = vmatpush3.bf16.msra.mxu0 %v1997_v49  ;;  %1928 = vmatprep.mubr.msk.f32.mxu0 %vm825_vm2, %v1181_v55 }
 0x4ce   :  { %2002 = vmatprep.subr.bf16.mxu0 %v2001_v54  ;;  %v1183_v56 = vpop.permute.xlu1 %1182 }
 0x4d1   :  { %2004 = vmatpush3.bf16.msra.mxu0 %v2001_v54  ;;  %v2269_v54 = vld [vmem:[%s2905_s5] ss:$0 sm:$0xff] }
 0x4d2   :  { %2011 = vmatprep.subr.bf16.mxu0 %v2294_v2  ;;  %v1185_v57 = vpop.permute.xlu0 %1184  ;;  %v188_v55 = vadd.f32 %v2269_v54, %v2500_v19 }
 0x4d4   :  { %1929 = vmatmul.mubr.msk.f32.vlgmr.msra.gmra.mrb[20].mxu0 %vm825_vm2, %v1183_v56 }
 0x4d5   :  { %1931 = vmatprep.mubr.msk.f32.mxu0 %vm825_vm2, %v1185_v57 }
 0x4d6   :  { %v1187_v58 = vpop.permute.xlu1 %1186 }
 0x4d8   :  { %1932 = vmatmul.mubr.msk.f32.gmra.mrb[22].mxu0 %vm825_vm2, %v1187_v58 }
 0x4d9   :  { %1953 = vmatprep.mubr.msk.f32.mxu0 %vm2295_vm0, %v2296_v4 }
 0x59f   :  { %v1077_v5 = vpop.f32.mrb[18].mxu0 }
 0x5a0   :  { %v1908_v6 = vpop.f32.mrb[19].mxu0  ;;  %1918 = vmatmul.mubr.msk.f32.vlgmr.msra.gmra.mrb[18].mxu1 %vm825_vm2, %v1077_v5 }
 0x5a1   :  { %1942 = vmatprep.mubr.msk.f32.mxu1 %vm2295_vm0, %v2296_v4 }
 0x5a7   :  { %v1930_v8 = vpop.f32.mrb[20].mxu0 }
 0x5a8   :  { %v1268_v9 = vadd.f32 %v1930_v8, %v1747_v7  ;;  %v1262_v10 = vpop.f32.mrb[21].mxu0 }
 0x5a9   :  { %v1263_v11 = vadd.f32 %v1747_v7, %v1262_v10 }
 0x5aa   :  { %2209 = vtanh.f32 %v1268_v9  ;;  %v1282_v0 = vsub.f32 0.0, %v1268_v9  ;;  %v512_v9 = vsub.f32 0.0, %v2502_v22 }
 0x5ab   :  { %2211 = vtanh.f32 %v1263_v11  ;;  %v1933_v12 = vpop.f32.mrb[22].mxu0  ;;  %v1281_v3 = vsub.f32 0.0, %v1263_v11 }
 0x5ac   :  { %v1278_v13 = vadd.f32 %v1933_v12, %v1747_v7  ;;  %v1272_v14 = vpop.f32.mrb[23].mxu0  ;;  %v1287_v25 = vmul.f32 1.442695, %v1282_v0  ;;  %v517_v10 = vmul.f32 1.442695, %v512_v9 }
 0x5ad   :  { %v1273_v15 = vadd.f32 %v1747_v7, %v1272_v14  ;;  %v1285_v26 = vmul.f32 1.442695, %v1281_v3  ;;  %v231_v7 = vsub.f32 0.0, %v188_v55 }
 0x5ae   :  { %2213 = vtanh.f32 %v1278_v13  ;;  %v1284_v27 = vsub.f32 0.0, %v1278_v13 }
 0x5af   :  { %2215 = vtanh.f32 %v1273_v15  ;;  %v1283_v20 = vsub.f32 0.0, %v1273_v15  ;;  %v240_v8 = vmul.f32 1.442695, %v231_v7 }
 0x5b0   :  { %2217 = vpow2.f32 %v1287_v25  ;;  %v1291_v24 = vmul.f32 1.442695, %v1284_v27 }
 0x5b1   :  { %2219 = vpow2.f32 %v1285_v26  ;;  %v1289_v29 = vmul.f32 1.442695, %v1283_v20 }
 0x5b2   :  { %2221 = vpow2.f32 %v1291_v24 }
 0x5b3   :  { %2223 = vpow2.f32 %v1289_v29 }
 0x5b4   :  { %v2210_v16 = vpop.eup %2209 }
 0x5b5   :  { %v2212_v17 = vpop.eup %2211  ;;  %1315 = vrot.lane.b32.xlu1 %v2210_v16, %s2297_s10 }
 0x5b6   :  { %1313 = vrot.lane.b32.xlu0 %v2212_v17, %s2297_s10 }
 0x5b8   :  { %v2214_v18 = vpop.eup %2213 }
 0x5b9   :  { %v2216_v21 = vpop.eup %2215  ;;  %1319 = vrot.lane.b32.xlu1 %v2214_v18, %s2297_s10 }
 0x5ba   :  { %1317 = vrot.lane.b32.xlu0 %v2216_v21, %s2297_s10  ;;  %v2218_v23 = vpop.eup %2217 }
 0x5bb   :  { %v2220_v30 = vpop.eup %2219  ;;  %v1294_v32 = vadd.f32 1.0, %v2218_v23  ;;  %v1353_v23 = vld [vmem:[%s2909_s4] sm:$0xff] }
 0x5bc   :  { %v1293_v28 = vadd.f32 1.0, %v2220_v30  ;;  %v2222_v34 = vpop.eup %2221 }
 0x5bd   :  { %v2224_v31 = vpop.eup %2223  ;;  %2225 = vrcp.f32 %v1294_v32  ;;  %v1296_v33 = vadd.f32 1.0, %v2222_v34  ;;  %v1755_v32 = vld [vmem:[%s2883_s19] ss:$0 sm:$0xff]  ;;  %v1444_v34 = vld [vmem:[%s2881_s17 + $0x8] sm:$0xff] }
 0x5be   :  { %2227 = vrcp.f32 %v1293_v28  ;;  %v1295_v35 = vadd.f32 1.0, %v2224_v31  ;;  %v1443_v28 = vld [vmem:[%s2881_s17] sm:$0xff]  ;;  %v1445_v31 = vld [vmem:[%s2881_s17 + $0x10] sm:$0xff] }
 0x5bf   :  { %2229 = vrcp.f32 %v1296_v33  ;;  %v1446_v33 = vld [vmem:[%s2881_s17 + $0x18] sm:$0xff] }
 0x5c0   :  { %2231 = vrcp.f32 %v1295_v35  ;;  %v2015_v35 = vpack.c.bf16 %v1446_v33, %v1445_v31 }
 0x5c7   :  { %v2226_v36 = vpop.eup %2225 }
 0x5c8   :  { %v2228_v38 = vpop.eup %2227 }
 0x5c9   :  { %v2230_v42 = vpop.eup %2229 }
 0x5ca   :  { %v2232_v44 = vpop.eup %2231 }
 0x627   :  { %v1316_v37 = vpop.permute.xlu1 %1315 }
 0x628   :  { %v1326_v39 = vmul.f32 %v2226_v36, %v1316_v37  ;;  %v1314_v40 = vpop.permute.xlu0 %1313  ;;  %v1756_v37 = vld [vmem:[%s2884_s20] ss:$0 sm:$0xff] }
 0x629   :  { %v1325_v41 = vmul.f32 %v2228_v38, %v1314_v40 }
 0x62a   :  { %2233 = vtanh.f32 %v1326_v39 }
 0x62b   :  { %2235 = vtanh.f32 %v1325_v41  ;;  %v1320_v43 = vpop.permute.xlu1 %1319 }
 0x62c   :  { %v1328_v45 = vmul.f32 %v2230_v42, %v1320_v43  ;;  %v1318_v46 = vpop.permute.xlu0 %1317 }
 0x62d   :  { %v1327_v47 = vmul.f32 %v2232_v44, %v1318_v46 }
 0x62e   :  { %2237 = vtanh.f32 %v1328_v45 }
 0x62f   :  { %2239 = vtanh.f32 %v1327_v47 }
 0x630   :  { %2241 = vtanh.f32 %v188_v55 }
 0x631   :  { %2243 = vtanh.f32 %v2502_v22 }
 0x632   :  { %2245 = vpow2.f32 %v240_v8 }
 0x633   :  { %2247 = vpow2.f32 %v517_v10 }
 0x634   :  { %v2234_v48 = vpop.eup %2233 }
 0x635   :  { %v2236_v49 = vpop.eup %2235  ;;  %1339 = vrot.lane.b32.xlu1 %v2234_v48, %s2298_s1 }
 0x636   :  { %1337 = vrot.lane.b32.xlu0 %v2236_v49, %s2298_s1 }
 0x638   :  { %v2238_v50 = vpop.eup %2237 }
 0x639   :  { %v2240_v51 = vpop.eup %2239  ;;  %1343 = vrot.lane.b32.xlu1 %v2238_v50, %s2298_s1  ;;  %v1745_v50 = vld [vmem:[%s2878_s14] ss:$0 sm:$0xff] }
 0x63a   :  { %1341 = vrot.lane.b32.xlu0 %v2240_v51, %s2298_s1  ;;  %v2242_v5 = vpop.eup %2241 }
 0x63b   :  { %v2244_v19 = vpop.eup %2243 }
 0x63c   :  { %v2246_v11 = vpop.eup %2245 }
 0x63d   :  { %v258_v12 = vadd.f32 1.0, %v2246_v11  ;;  %v2248_v13 = vpop.eup %2247 }
 0x63e   :  { %v527_v14 = vadd.f32 1.0, %v2248_v13 }
 0x63f   :  { %2249 = vrcp.f32 %v258_v12 }
 0x640   :  { %2251 = vrcp.f32 %v527_v14 }
 0x649   :  { %v2250_v21 = vpop.eup %2249 }
 0x64a   :  { %v2252_v20 = vpop.eup %2251 }
 0x673   :  { %v2770_v52 = vpop.f32.mrb[18].mxu1 }
 0x674   :  { %v1919_v53 = vpop.f32.mrb[19].mxu1  ;;  %v1162_v51 = vadd.f32 %v1745_v50, %v2770_v52 }
 0x6a7   :  { %v1340_v56 = vpop.permute.xlu1 %1339 }
 0x6a8   :  { %v1350_v57 = vmul.f32 %v2226_v36, %v1340_v56  ;;  %v1338_v58 = vpop.permute.xlu0 %1337 }
 0x6a9   :  { %v1349_v59 = vmul.f32 %v2228_v38, %v1338_v58 }
 0x6ab   :  { %v2039_v60 = vpack.i.bf16 %v1350_v57, %v1349_v59  ;;  %v1344_v61 = vpop.permute.xlu1 %1343  ;;  %v1566_v57 = vmul.f32 %v1756_v37, %v1162_v51  ;;  %v1753_v59 = vld [vmem:[%s2882_s18] ss:$0 sm:$0xff] }
 0x6ac   :  { %v1352_v62 = vmul.f32 %v2230_v42, %v1344_v61  ;;  %v1342_v63 = vpop.permute.xlu0 %1341 }
 0x6ad   :  { %2040 = vrot.lane.b32.xlu0 %v2039_v60, %s2298_s1  ;;  %v1351_v1 = vmul.f32 %v2232_v44, %v1342_v63  ;;  %v1567_v58 = vsel %vm825_vm2, %v1566_v57, 0.0 }
 0x6af   :  { %v2044_v6 = vpack.i.bf16 %v1352_v62, %v1351_v1 }
 0x6b1   :  { %303 = vrot.lane.b32.xlu0 %v2242_v5, %s2297_s10  ;;  %2045 = vrot.lane.b32.xlu1 %v2044_v6, %s2298_s1 }
 0x6b5   :  { %552 = vrot.lane.b32.xlu1 %v2244_v19, %s2297_s10  ;;  %s2299_s10 = smov [#allocation2]  }
 0x6b6   :  { %s1710_s4 = sshll.u32 %s2299_s10, 4  ;;  %s1711_s4 = int_to_ptr.vmem [resolvable:$true] %s1710_s4 }
 0x6b7   :  { %p2275_p1 = scmp.lt.s32.totalorder %s1711_s4, %s1711_s4 }
 0x71f   :  { %v2041_v15 = vpop.permute.xlu0 %2040 }
 0x720   :  { %v2043_v16 = vunpack.i.h.bf16 %v2041_v15  ;;  %v2042_v17 = vunpack.i.l.bf16 %v2041_v15 }
 0x722   :  { %v2006_v18 = vpack.c.bf16 %v2043_v16, %v2042_v17 }
 0x723   :  { %v304_v0 = vpop.permute.xlu0 %303  ;;  %v2046_v25 = vpop.permute.xlu1 %2045 }
 0x724   :  { %v330_v3 = vmul.f32 %v2250_v21, %v304_v0  ;;  %2007 = vmatpush3.bf16.msra.mxu1 %v2006_v18  ;;  %v2048_v22 = vunpack.i.h.bf16 %v2046_v25  ;;  %v2047_v26 = vunpack.i.l.bf16 %v2046_v25 }
 0x725   :  { %2008 = vmatprep.subr.bf16.mxu1 %v2294_v2 }
 0x726   :  { %2253 = vtanh.f32 %v330_v3  ;;  %v2009_v27 = vpack.c.bf16 %v2048_v22, %v2047_v26  ;;  %v1610_v26 = vld [vmem:[%s2885_s21] sm:$0xff] }
 0x727   :  { %v553_v24 = vpop.permute.xlu1 %552 }
 0x728   :  { %v567_v29 = vmul.f32 %v2252_v20, %v553_v24  ;;  %2010 = vmatpush3.bf16.msra.mxu1 %v2009_v27  ;;  %v1611_v27 = vld [vmem:[%s2885_s21 + $0x8] sm:$0xff] }
 0x729   :  { %2017 = vmatprep.subr.bf16.mxu1 %v2294_v2  ;;  %v2018_v24 = vpack.c.bf16 %v1611_v27, %v1610_v26 }
 0x72a   :  { %2255 = vtanh.f32 %v567_v29  ;;  %v1613_v29 = vld [vmem:[%s2885_s21 + $0x18] sm:$0xff] }
 0x72b   :  { %1943 = vmatmul.mubr.msk.f32.vlgmr.msra.gmra.mrb[20].mxu1 %vm825_vm2, %v1353_v23 }
 0x72c   :  { %1964 = vmatprep.mubr.msk.f32.mxu1 %vm2295_vm0, %v2296_v4  ;;  %v2012_v4 = vpack.c.bf16 %v1444_v34, %v1443_v28  ;;  %2019 = vmatpush3.bf16.msra.mxu1 %v2018_v24 }
 0x72d   :  { %2020 = vmatprep.subr.bf16.mxu1 %v2294_v2 }
 0x72e   :  { %2013 = vmatpush3.bf16.msra.mxu0 %v2012_v4 }
 0x72f   :  { %2014 = vmatprep.subr.bf16.mxu0 %v2294_v2 }
 0x730   :  { %v2254_v30 = vpop.eup %2253 }
 0x731   :  { %357 = vrot.lane.b32.xlu0 %v2254_v30, %s2298_s1 }
 0x732   :  { %2016 = vmatpush3.bf16.msra.mxu0 %v2015_v35 }
 0x734   :  { %v2256_v36 = vpop.eup %2255 }
 0x735   :  { %1534 = vrot.lane.b32.xlu0 %v1755_v32, %s2298_s1  ;;  %582 = vrot.lane.b32.xlu1 %v2256_v36, %s2298_s1 }
 0x739   :  { %1551 = vrot.lane.b32.xlu1 %v1756_v37, %s2298_s1 }
 0x7a3   :  { %v358_v38 = vpop.permute.xlu0 %357 }
 0x7a4   :  { %v384_v40 = vmul.f32 %v2250_v21, %v358_v38 }
 0x7a7   :  { %v583_v39 = vpop.permute.xlu1 %582  ;;  %v1535_v44 = vpop.permute.xlu0 %1534 }
 0x7a8   :  { %v597_v41 = vmul.f32 %v2252_v20, %v583_v39  ;;  %v1612_v20 = vld [vmem:[%s2885_s21 + $0x10] sm:$0xff] }
 0x7a9   :  { %v2021_v30 = vpack.c.bf16 %v1613_v29, %v1612_v20 }
 0x7aa   :  { %v784_v42 = vadd.f32 %v597_v41, %v384_v40 }
 0x7ab   :  { %v1552_v43 = vpop.permute.xlu1 %1551  ;;  %2022 = vmatpush3.bf16.msra.mxu1 %v2021_v30 }
 0x7ac   :  { %v2813_v45 = vmul.f32 0.5, %v784_v42  ;;  %v1757_v42 = vld [vmem:[%s2886_s22] ss:$0 sm:$0xff] }
 0x7ae   :  { %v1554_v46 = vmul.f32 %v1552_v43, %v2813_v45  ;;  %v1537_v47 = vmul.f32 %v1535_v44, %v2813_v45 }
 0x7b0   :  { %1556 = vrot.lane.b32.xlu1 %v1554_v46, %s2298_s1  ;;  %1539 = vrot.lane.b32.xlu0 %v1537_v47, %s2298_s1 }
 0x7fe   :  { %v1439_v48 = vpop.f32.mrb[20].mxu1 }
 0x7ff   :  { %1954 = vmatmul.mubr.msk.f32.vlgmr.msra.gmra.mrb[24].mxu0 %vm825_vm2, %v1439_v48  ;;  %v1944_v49 = vpop.f32.mrb[21].mxu1 }
 0x822   :  { %v1557_v53 = vpop.permute.xlu1 %1556  ;;  %v1540_v54 = vpop.permute.xlu0 %1539 }
 0x823   :  { %v1559_v55 = vsel %vm825_vm2, %v1557_v53, 0.0  ;;  %v1542_v56 = vsel %vm825_vm2, %v1540_v54, 0.0 }
 0x824   :  { %1560 = vadd.xlane.f32.xlu1 %v1559_v55  ;;  %1543 = vadd.xlane.f32.xlu0 %v1542_v56 }
 0x828   :  { %1568 = vadd.xlane.f32.xlu0 %v1567_v58 }
 0x8b1   :  { %v1544_v1 = vpop.xlane.xlu0 %1543  ;;  %v1561_v6 = vpop.xlane.xlu1 %1560 }
 0x8b2   :  { %v1562_v7 = vadd.f32 %v1561_v6, %v1544_v1 }
 0x8b4   :  { %v1564_v9 = vmul.f32 0.01, %v1562_v7  ;;  %vm1563_vm4 = vcmp.ge.f32.partialorder %v1562_v7, 0.0 }
 0x8b5   :  { %v1569_v5 = vpop.xlane.xlu0 %1568 }
 0x8b6   :  { %v1570_v19 = vadd.f32 %v1569_v5, %v1544_v1  ;;  %v1565_v13 = vsel %vm1563_vm4, %v1562_v7, %v1564_v9 }
 0x8b8   :  { %v1572_v8 = vmul.f32 0.01, %v1570_v19  ;;  %vm1571_vm3 = vcmp.ge.f32.partialorder %v1570_v19, 0.0 }
 0x8ba   :  { %v1573_v11 = vsel %vm1571_vm3, %v1570_v19, %v1572_v8 }
 0x8bb   :  { %v1582_v15 = vmax.f32 %v1565_v13, %v1573_v11 }
 0x8d2   :  { %v1523_v60 = vpop.f32.mrb[24].mxu0 }
 0x8d3   :  { %v1524_v61 = vadd.f32 %v1753_v59, %v1523_v60  ;;  %v1955_v62 = vpop.f32.mrb[25].mxu0 }
 0x8d5   :  { %v1574_v52 = vmul.f32 %v1756_v37, %v1524_v61 }
 0x8d7   :  { %v1575_v63 = vsel %vm825_vm2, %v1574_v52, 0.0 }
 0x8d8   :  { %1576 = vadd.xlane.f32.xlu0 %v1575_v63 }
 0x965   :  { %v1577_v10 = vpop.xlane.xlu0 %1576 }
 0x966   :  { %v1578_v12 = vadd.f32 %v1577_v10, %v1544_v1 }
 0x968   :  { %vm1579_vm5 = vcmp.ge.f32.partialorder %v1578_v12, 0.0  ;;  %v1580_v14 = vmul.f32 0.01, %v1578_v12 }
 0x96a   :  { %v1581_v16 = vsel %vm1579_vm5, %v1578_v12, %v1580_v14 }
 0x96b   :  { %v1583_v17 = vmax.f32 %v1582_v15, %v1581_v16 }
 0x96d   :  { %v1584_v18 = vsub.f32 %v1565_v13, %v1583_v17  ;;  %v1587_v21 = vsub.f32 %v1573_v11, %v1583_v17  ;;  %v1590_v0 = vsub.f32 %v1581_v16, %v1583_v17 }
 0x96f   :  { %v1585_v3 = vmul.f32 1.442695, %v1584_v18  ;;  %v1588_v25 = vmul.f32 1.442695, %v1587_v21  ;;  %v1591_v22 = vmul.f32 1.442695, %v1590_v0 }
 0x971   :  { %2257 = vpow2.f32 %v1585_v3 }
 0x972   :  { %2259 = vpow2.f32 %v1588_v25 }
 0x973   :  { %2261 = vpow2.f32 %v1591_v22 }
 0x97b   :  { %v2258_v23 = vpop.eup %2257 }
 0x97c   :  { %v2260_v32 = vpop.eup %2259  ;;  %v1593_v35 = vmul.f32 %v2258_v23, %v2813_v45 }
 0x97d   :  { %v2262_v28 = vpop.eup %2261  ;;  %v1594_v34 = vmul.f32 %v2260_v32, %v1162_v51  ;;  %v1606_v31 = vadd.f32 %v2260_v32, %v2258_v23 }
 0x97e   :  { %v1600_v4 = vmul.f32 %v2262_v28, %v1524_v61 }
 0x97f   :  { %1596 = vrot.lane.b32.xlu1 %v1594_v34, %s2298_s1  ;;  %v1607_v33 = vadd.f32 %v2262_v28, %v1606_v31 }
 0x980   :  { %1602 = vrot.lane.b32.xlu0 %v1600_v4, %s2298_s1 }
 0x981   :  { %2263 = vrcp.f32 %v1607_v33 }
 0x98b   :  { %v2264_v40 = vpop.eup %2263 }
 0x9f1   :  { %v1597_v36 = vpop.permute.xlu1 %1596 }
 0x9f2   :  { %v1599_v37 = vadd.f32 %v1597_v36, %v1593_v35  ;;  %v1603_v38 = vpop.permute.xlu0 %1602 }
 0x9f4   :  { %v1605_v39 = vadd.f32 %v1603_v38, %v1599_v37 }
 0x9f6   :  { %v1609_v41 = vmul.f32 %v2264_v40, %v1605_v39 }
 0x9f8   :  { %1622 = vrot.lane.b32.xlu1 %v1609_v41, %s2298_s1  ;;  %s2270_s1 = scalar_lea.vmem %s1711_s4, 128 }
 0x9f9   :  { %p2271_p0 = scmp.ne.s32.totalorder %s1711_s4, %s2270_s1  ;;  %p2276_p2 = scmp.lt.s32.totalorder %s2270_s1, %s2270_s1 }
 0x9fb   :  { %p2277_p3 = por %p2276_p2, %p2275_p1 }
 0x9fd   :  { %p2278_p4 = pnand %p2277_p3, %p2271_p0 }
 0xa6a   :  { %v1623_v2 = vpop.permute.xlu1 %1622 }
 0xa6b   :  { %1965 = vmatmul.mubr.msk.f32.vlgmr.msra.gmra.mrb[22].mxu1 %vm825_vm2, %v1623_v2 }
 0xb3e   :  { %v1692_v43 = vpop.f32.mrb[22].mxu1 }
 0xb3f   :  { %v1693_v44 = vadd.f32 %v1757_v42, %v1692_v43  ;;  %v1966_v46 = vpop.f32.mrb[23].mxu1 }
 0xb41   :  { %v1696_v47 = vsub.f32 0.0, %v1693_v44 }
 0xb43   :  { %v1697_v45 = vmul.f32 1.442695, %v1696_v47 }
 0xb45   :  { %2265 = vpow2.f32 %v1697_v45 }
 0xb4f   :  { %v2266_v48 = vpop.eup %2265 }
 0xb50   :  { %v1699_v49 = vadd.f32 1.0, %v2266_v48 }
 0xb52   :  { %2267 = vrcp.f32 %v1699_v49 }
 0xb5c   :  { %v2268_v50 = vpop.eup %2267 }
 0xb5d   :  { %1703 = vst.msk [vmem:[#allocation2] sm:$0xff] %vm1702_vm6, %v2268_v50 }
 0xb5e   :  { %2281 = shalt.err (!%p2278_p4)
}
 0xb5f   :  { %s2282_s11 = scalar_lea.hbm %s2887_s23, 128 }
 0xb60   :  { %p2283_p5 = scmp.ne.s32.totalorder %s2887_s23, %s2282_s11  ;;  %p2286_p6 = scmp.lt.u32.totalorder %s2282_s11, %s2887_s23 }
 0xb62   :  { %p2288_p7 = pnand %p2286_p6, %p2283_p5 }
 0xb64   :  { %2291 = shalt.err (!%p2288_p7)
}
 0xb65   :  { %1713 = dma.vmem_to_hbm [thread:$0]  %s1711_s4, 128, %s2887_s23, [#allocation3]  }
 0xb66   :  { %2292 = dma.done.wait [#allocation3], 128  }
 0xb67   :  { %2293 = vsyncadd [#allocation3], 4294967168 }
 0xb68   :  { %1717 = vsyncpa [#allocation3], 1 }

</bundles_post_ra>
